<compile_context>
chip_gen: v5e
topology: v5e:2x2
jax: 0.10.0
libtpu: 0.0.40
codegen_flags: <defaults>
</compile_context>

<pallas_src>
import functools

import jax
import jax.numpy as jnp
from jax import lax
from jax.experimental import pallas as pl
from jax.experimental.pallas import tpu as pltpu


def _round_up(x, m):
    return (x + m - 1) // m * m


def _conv2d_kernel(x_ref, w_ref, b_ref, o_ref, acc_ref):
    # x_ref:   (TR, Wp, K*Cin)   TR output rows, padded width, kh-folded channels
    # w_ref:   (K, K*Cin, Cout_p)
    # b_ref:   (1, Cout_p)       f32
    # o_ref:   (TR * Wo_t, Cout_p)
    # acc_ref: (TR * Wo_t, Cout_p) f32 VMEM scratch accumulator
    TR, Wp, KCin = x_ref.shape
    K = w_ref.shape[0]
    Wo_t = o_ref.shape[0] // TR

    # Accumulator initialized with the broadcast bias (saves a full add pass).
    acc_ref[...] = jnp.broadcast_to(b_ref[...].astype(jnp.float32),
                                    acc_ref.shape)

    for kw in range(K):
        x = x_ref[...]
        if kw:
            # Shift the width axis left by kw: XLU sublane rotate (~free),
            # equivalent to jnp.roll(x, -kw, axis=1). Wrapped columns land in
            # the region cropped away below.
            x = pltpu.roll(x, shift=Wp - kw, axis=1)
        # Offset-0 crop (aligned, cheap) then fold rows for a 2-D MXU matmul of
        # depth K*Cin.  Wo_t is a multiple of 8 so the reshape is layout-free.
        lhs = x[:, :Wo_t, :].reshape(TR * Wo_t, KCin).astype(w_ref.dtype)
        acc_ref[...] += jnp.dot(lhs, w_ref[kw],
                                preferred_element_type=jnp.float32)

    o_ref[...] = acc_ref[...].astype(o_ref.dtype)


def _pick_row_tile(total_rows, Wp_t, Wo_t, KCin, Cout_p):
    """Rows per grid step so double-buffered tiles + f32 acc stay well under VMEM."""
    in_row = Wp_t * _round_up(KCin, 128) * 4          # VMEM lane-pads to 128
    out_row = Wo_t * Cout_p * 4
    per_row = 2 * in_row + 3 * out_row                # 2x in, 2x out, 1x f32 acc
    budget = 40 * 1024 * 1024                         # fits v7x's 64 MiB VMEM
    tr = max(8, min(budget // per_row, 128))
    return int(min(tr, _round_up(total_rows, 8)))


@functools.partial(jax.jit,
                   static_argnames=("padding", "compute_dtype", "row_tile"))
def my_conv2d(x, weight, bias, padding=None, compute_dtype=None, row_tile=None):
    """x: (N, Cin, H, W); weight: (Cout, Cin, K, K); bias: (Cout,)."""
    Cout, Cin, K, _ = weight.shape
    if padding is None:
        padding = K // 2
    N, _, H, W = x.shape
    Ho = H + 2 * padding - K + 1
    Wo = W + 2 * padding - K + 1

    # ---------------- wrapper-side layout plumbing (plain JAX) ---------------
    Cout_p = _round_up(Cout, 128)            # lane-dense output -> unmasked vst
    Wo_t = _round_up(Wo, 8)                  # sublane-aligned tile width
    Wp_t = _round_up(Wo_t + K - 1, 8)        # padded width incl. kw halo
    KCin = K * Cin

    x_nhwc = jnp.transpose(x, (0, 2, 3, 1))                      # (N, H, W, Cin)
    x_pad = jnp.pad(
        x_nhwc,
        ((0, 0), (padding, padding), (padding, Wp_t - W - padding), (0, 0)))
    # Fold vertical taps into the channel axis:
    #   x_khf[n, oh, w, kh*Cin + ci] = x_pad[n, oh + kh, w, ci]
    x_khf = jnp.stack([x_pad[:, kh:kh + Ho] for kh in range(K)], axis=3)
    x_rows = x_khf.reshape(N * Ho, Wp_t, KCin)      # one row == one output row

    R = N * Ho
    TR = row_tile if row_tile is not None else _pick_row_tile(
        R, Wp_t, Wo_t, KCin, Cout_p)
    TR = int(min(TR, _round_up(R, 8)))
    n_tiles = (R + TR - 1) // TR
    R_pad = n_tiles * TR
    if R_pad > R:
        x_rows = jnp.pad(x_rows, ((0, R_pad - R), (0, 0), (0, 0)))

    # Weight: (Cout, Cin, Kh, Kw) -> (Kw, Kh*Cin, Cout_p), matching the kh-fold.
    w_fold = jnp.transpose(weight, (3, 2, 1, 0)).reshape(K, KCin, Cout)
    w_fold = jnp.pad(w_fold, ((0, 0), (0, 0), (0, Cout_p - Cout)))
    if compute_dtype is not None:
        w_fold = w_fold.astype(compute_dtype)        # e.g. bf16 on v6e/v7x
    b_pad = jnp.pad(bias, (0, Cout_p - Cout)).reshape(1, Cout_p)
    b_pad = b_pad.astype(jnp.float32)

    # --------------------------- Pallas call ---------------------------------
    out_flat = pl.pallas_call(
        _conv2d_kernel,
        out_shape=jax.ShapeDtypeStruct((R_pad * Wo_t, Cout_p), x.dtype),
        grid_spec=pltpu.PrefetchScalarGridSpec(
            num_scalar_prefetch=0,
            grid=(n_tiles,),
            in_specs=[
                pl.BlockSpec((TR, Wp_t, KCin), lambda t: (t, 0, 0)),
                pl.BlockSpec((K, KCin, Cout_p), lambda t: (0, 0, 0)),
                pl.BlockSpec((1, Cout_p), lambda t: (0, 0)),
            ],
            out_specs=pl.BlockSpec((TR * Wo_t, Cout_p), lambda t: (t, 0)),
            scratch_shapes=[pltpu.VMEM((TR * Wo_t, Cout_p), jnp.float32)],
        ),
        compiler_params=pltpu.CompilerParams(
            dimension_semantics=("parallel",),
            vmem_limit_bytes=48 * 1024 * 1024),
    )(x_rows, w_fold, b_pad)

    # ----------------------- undo the layout plumbing ------------------------
    out = out_flat.reshape(R_pad, Wo_t, Cout_p)[:R]
    out = out.reshape(N, Ho, Wo_t, Cout_p)[:, :, :Wo, :Cout]
    return jnp.transpose(out, (0, 3, 1, 2))          # back to NCHW


def init_params(key, in_channels, out_channels, kernel_size):
    # Matches MyConv2d.reset_parameters: uniform(-stdv, stdv),
    # stdv = 1/sqrt(in_channels * k * k).
    n = in_channels * kernel_size * kernel_size
    stdv = 1.0 / (n ** 0.5)
    kw_, kb_ = jax.random.split(key)
    weight = jax.random.uniform(
        kw_, (out_channels, in_channels, kernel_size, kernel_size),
        dtype=jnp.float32, minval=-stdv, maxval=stdv)
    bias = jax.random.uniform(
        kb_, (out_channels,), dtype=jnp.float32, minval=-stdv, maxval=stdv)
    return weight, bias


if __name__ == "__main__":
    key = jax.random.PRNGKey(0)
    k_x, k_p = jax.random.split(key)

    N, Cin, H, W = 2, 4, 16, 16
    Cout, K = 8, 3

    x = jax.random.normal(k_x, (N, Cin, H, W), dtype=jnp.float32)
    weight, bias = init_params(k_p, Cin, Cout, K)

    # Default f32 path (matches PyTorch float32 forward semantics).
    out = my_conv2d(x, weight, bias)     # padding=None -> K//2, as in the module
    out = jax.block_until_ready(out)

    # Reference: XLA conv (same semantics as F.conv2d with padding=K//2).
    ref = lax.conv_general_dilated(
        x, weight, window_strides=(1, 1),
        padding=[(K // 2, K // 2), (K // 2, K // 2)],
        dimension_numbers=("NCHW", "OIHW", "NCHW"),
    ) + bias.reshape(1, Cout, 1, 1)

    assert out.shape == (N, Cout, H, W), out.shape
    assert jnp.allclose(out, ref, atol=1e-4, rtol=1e-4), float(
        jnp.max(jnp.abs(out - ref)))

    # Optional bf16-matmul path (v6e/v7x MXU peak; f32 accumulation).
    out_bf16 = jax.block_until_ready(
        my_conv2d(x, weight, bias, compute_dtype=jnp.bfloat16))
    assert jnp.allclose(out_bf16, ref, atol=5e-2, rtol=0.0), float(
        jnp.max(jnp.abs(out_bf16 - ref)))

    print("KERNEL_OK")
</pallas_src>

<mosaic_0001>
module attributes {stable_mosaic.version = 11 : i64} {
  func.func @_conv2d_kernel(%arg0: i32, %arg1: memref<32x24x12xf32, #tpu.memory_space<vmem>>, %arg2: memref<3x12x128xf32, #tpu.memory_space<vmem>>, %arg3: memref<1x128xf32, #tpu.memory_space<vmem>>, %arg4: memref<512x128xf32, #tpu.memory_space<vmem>>, %arg5: memref<512x128xf32, #tpu.memory_space<vmem>>) attributes {dimension_semantics = [#tpu.dimension_semantics<parallel>], iteration_bounds = array<i64: 1>, scalar_prefetch = 0 : i64, scratch_operands = 1 : i64, tpu.core_type = #tpu.core_type<tc>, window_params = [{transform_indices = @transform_0, window_bounds = array<i64: 32, 24, 12>}, {pipeline_mode = #tpu.pipeline_mode<synchronous>, transform_indices = @transform_1, window_bounds = array<i64: 3, 12, 128>}, {pipeline_mode = #tpu.pipeline_mode<synchronous>, transform_indices = @transform_2, window_bounds = array<i64: 1, 128>}, {transform_indices = @transform_3, window_bounds = array<i64: 512, 128>}]} {
    %c0 = arith.constant 0 : index
    %c0_0 = arith.constant 0 : index
    %0 = vector.load %arg3[%c0, %c0_0] : memref<1x128xf32, #tpu.memory_space<vmem>>, vector<1x128xf32>
    %1 = vector.shape_cast %0 : vector<1x128xf32> to vector<1x128xf32>
    %2 = vector.broadcast %1 : vector<1x128xf32> to vector<512x128xf32>
    %c0_1 = arith.constant 0 : index
    %c0_2 = arith.constant 0 : index
    %3 = vector.load %arg5[%c0_1, %c0_2] : memref<512x128xf32, #tpu.memory_space<vmem>>, vector<512x128xf32>
    tpu.vector_store %arg5[%c0_1, %c0_2], %2 {strides = array<i32>} : memref<512x128xf32, #tpu.memory_space<vmem>>, vector<512x128xf32>,
    %c0_3 = arith.constant 0 : index
    %c0_4 = arith.constant 0 : index
    %c0_5 = arith.constant 0 : index
    %4 = vector.load %arg1[%c0_3, %c0_4, %c0_5] : memref<32x24x12xf32, #tpu.memory_space<vmem>>, vector<32x24x12xf32>
    %5 = vector.extract_strided_slice %4 {offsets = [0, 0, 0], sizes = [32, 16, 12], strides = [1, 1, 1]} : vector<32x24x12xf32> to vector<32x16x12xf32>
    %6 = vector.shape_cast %5 : vector<32x16x12xf32> to vector<512x12xf32>
    %c0_6 = arith.constant 0 : index
    %c0_7 = arith.constant 0 : index
    %7 = vector.load %arg5[%c0_6, %c0_7] : memref<512x128xf32, #tpu.memory_space<vmem>>, vector<512x128xf32>
    %c0_8 = arith.constant 0 : index
    %c0_9 = arith.constant 0 : index
    %c0_10 = arith.constant 0 : index
    %8 = vector.load %arg2[%c0_8, %c0_9, %c0_10] : memref<3x12x128xf32, #tpu.memory_space<vmem>>, vector<1x12x128xf32>
    %9 = vector.shape_cast %8 : vector<1x12x128xf32> to vector<12x128xf32>
    %cst = arith.constant dense<0.000000e+00> : vector<512x128xf32>
    %10 = tpu.matmul %6, %9, %cst {dimension_numbers = #tpu.dot_dimension_numbers<[1], [0], [0], [1], [0, 0, 1, 1], [], []>} : vector<512x12xf32>, vector<12x128xf32>, vector<512x128xf32> -> vector<512x128xf32>
    %11 = arith.addf %7, %10 : vector<512x128xf32>
    %c0_11 = arith.constant 0 : index
    %c0_12 = arith.constant 0 : index
    %12 = vector.load %arg5[%c0_11, %c0_12] : memref<512x128xf32, #tpu.memory_space<vmem>>, vector<512x128xf32>
    tpu.vector_store %arg5[%c0_11, %c0_12], %11 {strides = array<i32>} : memref<512x128xf32, #tpu.memory_space<vmem>>, vector<512x128xf32>,
    %c0_13 = arith.constant 0 : index
    %c0_14 = arith.constant 0 : index
    %c0_15 = arith.constant 0 : index
    %13 = vector.load %arg1[%c0_13, %c0_14, %c0_15] : memref<32x24x12xf32, #tpu.memory_space<vmem>>, vector<32x24x12xf32>
    %c23_i32 = arith.constant 23 : i32
    %14 = tpu.dynamic_rotate %13 by %c23_i32 dim 1 : vector<32x24x12xf32>, i32 -> vector<32x24x12xf32>
    %15 = vector.extract_strided_slice %14 {offsets = [0, 0, 0], sizes = [32, 16, 12], strides = [1, 1, 1]} : vector<32x24x12xf32> to vector<32x16x12xf32>
    %16 = vector.shape_cast %15 : vector<32x16x12xf32> to vector<512x12xf32>
    %c0_16 = arith.constant 0 : index
    %c0_17 = arith.constant 0 : index
    %17 = vector.load %arg5[%c0_16, %c0_17] : memref<512x128xf32, #tpu.memory_space<vmem>>, vector<512x128xf32>
    %c1 = arith.constant 1 : index
    %c0_18 = arith.constant 0 : index
    %c0_19 = arith.constant 0 : index
    %18 = vector.load %arg2[%c1, %c0_18, %c0_19] : memref<3x12x128xf32, #tpu.memory_space<vmem>>, vector<1x12x128xf32>
    %19 = vector.shape_cast %18 : vector<1x12x128xf32> to vector<12x128xf32>
    %cst_20 = arith.constant dense<0.000000e+00> : vector<512x128xf32>
    %20 = tpu.matmul %16, %19, %cst_20 {dimension_numbers = #tpu.dot_dimension_numbers<[1], [0], [0], [1], [0, 0, 1, 1], [], []>} : vector<512x12xf32>, vector<12x128xf32>, vector<512x128xf32> -> vector<512x128xf32>
    %21 = arith.addf %17, %20 : vector<512x128xf32>
    %c0_21 = arith.constant 0 : index
    %c0_22 = arith.constant 0 : index
    %22 = vector.load %arg5[%c0_21, %c0_22] : memref<512x128xf32, #tpu.memory_space<vmem>>, vector<512x128xf32>
    tpu.vector_store %arg5[%c0_21, %c0_22], %21 {strides = array<i32>} : memref<512x128xf32, #tpu.memory_space<vmem>>, vector<512x128xf32>,
    %c0_23 = arith.constant 0 : index
    %c0_24 = arith.constant 0 : index
    %c0_25 = arith.constant 0 : index
    %23 = vector.load %arg1[%c0_23, %c0_24, %c0_25] : memref<32x24x12xf32, #tpu.memory_space<vmem>>, vector<32x24x12xf32>
    %c22_i32 = arith.constant 22 : i32
    %24 = tpu.dynamic_rotate %23 by %c22_i32 dim 1 : vector<32x24x12xf32>, i32 -> vector<32x24x12xf32>
    %25 = vector.extract_strided_slice %24 {offsets = [0, 0, 0], sizes = [32, 16, 12], strides = [1, 1, 1]} : vector<32x24x12xf32> to vector<32x16x12xf32>
    %26 = vector.shape_cast %25 : vector<32x16x12xf32> to vector<512x12xf32>
    %c0_26 = arith.constant 0 : index
    %c0_27 = arith.constant 0 : index
    %27 = vector.load %arg5[%c0_26, %c0_27] : memref<512x128xf32, #tpu.memory_space<vmem>>, vector<512x128xf32>
    %c2 = arith.constant 2 : index
    %c0_28 = arith.constant 0 : index
    %c0_29 = arith.constant 0 : index
    %28 = vector.load %arg2[%c2, %c0_28, %c0_29] : memref<3x12x128xf32, #tpu.memory_space<vmem>>, vector<1x12x128xf32>
    %29 = vector.shape_cast %28 : vector<1x12x128xf32> to vector<12x128xf32>
    %cst_30 = arith.constant dense<0.000000e+00> : vector<512x128xf32>
    %30 = tpu.matmul %26, %29, %cst_30 {dimension_numbers = #tpu.dot_dimension_numbers<[1], [0], [0], [1], [0, 0, 1, 1], [], []>} : vector<512x12xf32>, vector<12x128xf32>, vector<512x128xf32> -> vector<512x128xf32>
    %31 = arith.addf %27, %30 : vector<512x128xf32>
    %c0_31 = arith.constant 0 : index
    %c0_32 = arith.constant 0 : index
    %32 = vector.load %arg5[%c0_31, %c0_32] : memref<512x128xf32, #tpu.memory_space<vmem>>, vector<512x128xf32>
    tpu.vector_store %arg5[%c0_31, %c0_32], %31 {strides = array<i32>} : memref<512x128xf32, #tpu.memory_space<vmem>>, vector<512x128xf32>,
    %c0_33 = arith.constant 0 : index
    %c0_34 = arith.constant 0 : index
    %33 = vector.load %arg5[%c0_33, %c0_34] : memref<512x128xf32, #tpu.memory_space<vmem>>, vector<512x128xf32>
    %c0_35 = arith.constant 0 : index
    %c0_36 = arith.constant 0 : index
    %34 = vector.load %arg4[%c0_35, %c0_36] : memref<512x128xf32, #tpu.memory_space<vmem>>, vector<512x128xf32>
    tpu.vector_store %arg4[%c0_35, %c0_36], %33 {strides = array<i32>} : memref<512x128xf32, #tpu.memory_space<vmem>>, vector<512x128xf32>,
    return
  }
  func.func @transform_0(%arg0: i32) -> (i32, i32, i32) {
    %c0_i32 = arith.constant 0 : i32
    %c0_i32_0 = arith.constant 0 : i32
    %c0_i32_1 = arith.constant 0 : i32
    return %arg0, %c0_i32, %c0_i32_0 : i32, i32, i32
  }
  func.func @transform_1(%arg0: i32) -> (i32, i32, i32) {
    %c0_i32 = arith.constant 0 : i32
    %c0_i32_0 = arith.constant 0 : i32
    %c0_i32_1 = arith.constant 0 : i32
    %c0_i32_2 = arith.constant 0 : i32
    return %c0_i32, %c0_i32_0, %c0_i32_1 : i32, i32, i32
  }
  func.func @transform_2(%arg0: i32) -> (i32, i32) {
    %c0_i32 = arith.constant 0 : i32
    %c0_i32_0 = arith.constant 0 : i32
    %c0_i32_1 = arith.constant 0 : i32
    return %c0_i32, %c0_i32_0 : i32, i32
  }
  func.func @transform_3(%arg0: i32) -> (i32, i32) {
    %c0_i32 = arith.constant 0 : i32
    %c0_i32_0 = arith.constant 0 : i32
    return %arg0, %c0_i32 : i32, i32
  }
}

</mosaic_0001>

<bundles_post_ra>
// kernel: my_conv2d.1
= control target key start
LH: loop header
LB: loop body
LE: loop exit
PB: predicated region body
PF: predicated region fallthrough
CT: control target
= control target key end

     0   :  { %vm405_vm0 = vcmask 1043456   ;;  %v938_v0 = vlaneseq  ;;  %vm212_vm1 = vcmask 97280   ;;  %s4089_s1 = inlined_call_operand.vmem [shape: f32[3,12,128], index: 1, kind: input, shape index: {}]   ;;  %s4090_s0 = inlined_call_operand.vmem [shape: f32[32,24,12], index: 0, kind: input, shape index: {}]   ;;  %s4091_s2 = inlined_call_operand.vmem [shape: f32[1,128], index: 2, kind: input, shape index: {}]   ;;  %s4092_s3 = inlined_call_operand.vmem [shape: f32[512,128], index: 3, kind: output, shape index: {}]  }
   0x1   :  { %v211_v1 = vld [vmem:[%s4089_s1 + $0x8] sm:$0xf]  ;;  %v210_v3 = vld [vmem:[%s4089_s1] sm:$0xff]  ;;  %v2658_v6 = vld [vmem:[%s4089_s1 + $0x18] sm:$0xf] }
   0x2   :  { %v2725_v2 = vld [vmem:[%s4089_s1 + $0x28] sm:$0xf]  ;;  %2791 = vmatpush.msk.msra.mxu3 %vm405_vm0, %v211_v1  ;;  %v2833_v4 = vld [vmem:[%s4090_s0 + $0x240] sm:$0xff]  ;;  %v2841_v7 = vshrl.u32 %v938_v0, 7  ;;  %2592 = vmatpush.msk.msra.mxu0 %vm405_vm0, %v211_v1  ;;  %v2657_v12 = vld [vmem:[%s4089_s1 + $0x10] sm:$0xff] }
   0x3   :  { %2726 = vmatpush.msk.msra.mxu2 %vm405_vm0, %v2725_v2  ;;  %v2724_v5 = vld [vmem:[%s4089_s1 + $0x20] sm:$0xff]  ;;  %v1605_v9 = vld [vmem:[%s4090_s0 + $0x8] sm:$0xff]  ;;  %2659 = vmatpush.msk.msra.mxu1 %vm405_vm0, %v2658_v6  ;;  %v1606_v15 = vld [vmem:[%s4090_s0 + $0x10] sm:$0xff] }
   0x4   :  { %v1604_v8 = vld [vmem:[%s4090_s0] sm:$0xff]  ;;  %2792 = vmatpush.msra.mxu3 %v210_v3  ;;  %v1732_v11 = vrot.slane %v1605_v9, 2  ;;  %vm1796_vm2 = vcmp.lt.s32.totalorder %v2841_v7, 6  ;;  %424 = vmatpush.msra.mxu0 %v210_v3  ;;  %v874_v14 = vrot.slane %v1605_v9, 1  ;;  %vm940_vm3 = vcmp.lt.s32.totalorder %v2841_v7, 7  ;;  %v2873_v20 = vld [vmem:[%s4090_s0 + $0x248] sm:$0xff] }
   0x5   :  { %2138 = vmatpush.msra.mxu2 %v2724_v5  ;;  %v1700_v10 = vrot.slane %v1604_v8, 2  ;;  %v842_v13 = vrot.slane %v1604_v8, 1  ;;  %2641 = vmatmul.msk.f32.vlgmr.msra.gmra.mxu3 %vm212_vm1, %v2833_v4  ;;  %v1764_v18 = vrot.slane %v1606_v15, 2  ;;  %v906_v19 = vrot.slane %v1606_v15, 1  ;;  %v1607_v23 = vld [vmem:[%s4090_s0 + $0x18] sm:$0xff]  ;;  %v1608_v24 = vld [vmem:[%s4090_s0 + $0x20] sm:$0xff] }
   0x6   :  { %2793 = vmatpush.msk.msrb.mxu3 %vm405_vm0, %v2658_v6  ;;  %2593 = vmatmul.msk.f32.vlgmr.msra.gmra.mxu0 %vm212_vm1, %v1604_v8  ;;  %v1701_v25 = vrot.slane %v1607_v23, 2  ;;  %v1733_v26 = vrot.slane %v1608_v24, 2  ;;  %v843_v27 = vrot.slane %v1607_v23, 1  ;;  %v875_v28 = vrot.slane %v1608_v24, 1  ;;  %v2893_v29 = vld [vmem:[%s4090_s0 + $0x258] sm:$0xff]  ;;  %v1609_v32 = vld [vmem:[%s4090_s0 + $0x28] sm:$0xff] }
   0x7   :  { %v1829_v16 = vsel %vm1796_vm2, %v1700_v10, %v1732_v11  ;;  %1282 = vmatpush.msra.mxu1 %v2657_v12  ;;  %v973_v17 = vsel %vm940_vm3, %v842_v13, %v874_v14  ;;  %v1797_v21 = vsel %vm1796_vm2, %v1732_v11, %v1764_v18  ;;  %v941_v22 = vsel %vm940_vm3, %v874_v14, %v906_v19  ;;  %v2910_v35 = vld [vmem:[%s4090_s0 + $0x260] sm:$0xff]  ;;  %v1610_v38 = vld [vmem:[%s4090_s0 + $0x30] sm:$0xff]  ;;  %v1611_v39 = vld [vmem:[%s4090_s0 + $0x38] sm:$0xff] }
   0x8   :  { %2727 = vmatmul.msk.f32.vlgmr.msra.gmra.mxu2 %vm212_vm1, %v1829_v16  ;;  %2660 = vmatmul.msk.f32.vlgmr.msra.gmra.mxu1 %vm212_vm1, %v973_v17  ;;  %v1830_v30 = vsel %vm1796_vm2, %v1701_v25, %v1733_v26  ;;  %v974_v31 = vsel %vm940_vm3, %v843_v27, %v875_v28  ;;  %v1765_v33 = vrot.slane %v1609_v32, 2  ;;  %v907_v34 = vrot.slane %v1609_v32, 1  ;;  %v2930_v44 = vld [vmem:[%s4090_s0 + $0x270] sm:$0xff]  ;;  %v1612_v47 = vld [vmem:[%s4090_s0 + $0x40] sm:$0xff]  ;;  %v2947_v50 = vld [vmem:[%s4090_s0 + $0x278] sm:$0xff] }
   0x9   :  { %2794 = vmatpush.msrb.mxu3 %v2657_v12  ;;  %v1702_v40 = vrot.slane %v1610_v38, 2  ;;  %v1734_v41 = vrot.slane %v1611_v39, 2  ;;  %v844_v42 = vrot.slane %v1610_v38, 1  ;;  %v876_v43 = vrot.slane %v1611_v39, 1  ;;  %v1613_v53 = vld [vmem:[%s4090_s0 + $0x48] sm:$0xff]  ;;  %v1614_v54 = vld [vmem:[%s4090_s0 + $0x50] sm:$0xff] }
   0xa   :  { %v1798_v36 = vsel %vm1796_vm2, %v1733_v26, %v1765_v33  ;;  %v942_v37 = vsel %vm940_vm3, %v875_v28, %v907_v34  ;;  %v1766_v48 = vrot.slane %v1612_v47, 2  ;;  %v908_v49 = vrot.slane %v1612_v47, 1  ;;  %v2967_v59 = vld [vmem:[%s4090_s0 + $0x288] sm:$0xff]  ;;  %v1615_v62 = vld [vmem:[%s4090_s0 + $0x58] sm:$0xff]  ;;  %v2984_v1 = vld [vmem:[%s4090_s0 + $0x290] sm:$0xff] }
   0xb   :  { %2795 = vmatpush.msk.msra.mxu3 %vm405_vm0, %v2725_v2  ;;  %v1831_v45 = vsel %vm1796_vm2, %v1702_v40, %v1734_v41  ;;  %v975_v46 = vsel %vm940_vm3, %v844_v42, %v876_v43  ;;  %v1703_v55 = vrot.slane %v1613_v53, 2  ;;  %v1735_v56 = vrot.slane %v1614_v54, 2  ;;  %v1617_v6 = vld [vmem:[%s4090_s0 + $0x68] sm:$0xff]  ;;  %v3004_v12 = vld [vmem:[%s4090_s0 + $0x2a0] sm:$0xff]  ;;  %v1618_v15 = vld [vmem:[%s4090_s0 + $0x70] sm:$0xff] }
   0xc   :  { %v1799_v51 = vsel %vm1796_vm2, %v1734_v41, %v1766_v48  ;;  %v943_v52 = vsel %vm940_vm3, %v876_v43, %v908_v49  ;;  %v845_v57 = vrot.slane %v1613_v53, 1  ;;  %v877_v58 = vrot.slane %v1614_v54, 1  ;;  %v3021_v18 = vld [vmem:[%s4090_s0 + $0x2a8] sm:$0xff]  ;;  %v3041_v28 = vld [vmem:[%s4090_s0 + $0x2b8] sm:$0xff]  ;;  %v1624_v49 = vld [vmem:[%s4090_s0 + $0xa0] sm:$0xff] }
   0xd   :  { %2796 = vmatpush.msra.mxu3 %v2724_v5  ;;  %v1832_v60 = vsel %vm1796_vm2, %v1703_v55, %v1735_v56  ;;  %v1767_v63 = vrot.slane %v1615_v62, 2  ;;  %v909_v0 = vrot.slane %v1615_v62, 1  ;;  %v1616_v5 = vld [vmem:[%s4090_s0 + $0x60] sm:$0xff]  ;;  %v878_v11 = vrot.slane %v1617_v6, 1  ;;  %v1621_v32 = vld [vmem:[%s4090_s0 + $0x88] sm:$0xff]  ;;  %v1623_v40 = vld [vmem:[%s4090_s0 + $0x98] sm:$0xff] }
   0xe   :  { %2642 = vmatmul.msk.f32.gmra.mxu3 %vm212_vm1, %v2873_v20  ;;  %2594 = vmatmul.msk.f32.gmra.mxu0 %vm212_vm1, %v1605_v9  ;;  %v976_v61 = vsel %vm940_vm3, %v845_v57, %v877_v58  ;;  %v1704_v8 = vrot.slane %v1616_v5, 2  ;;  %v1736_v9 = vrot.slane %v1617_v6, 2  ;;  %v846_v10 = vrot.slane %v1616_v5, 1  ;;  %v1626_v57 = vld [vmem:[%s4090_s0 + $0xb0] sm:$0xff] }
   0xf   :  { %v1800_v2 = vsel %vm1796_vm2, %v1735_v56, %v1767_v63  ;;  %v944_v3 = vsel %vm940_vm3, %v877_v58, %v909_v0  ;;  %v1768_v16 = vrot.slane %v1618_v15, 2  ;;  %v910_v17 = vrot.slane %v1618_v15, 1  ;;  %v1625_v56 = vld [vmem:[%s4090_s0 + $0xa8] sm:$0xff] }
  0x10   :  { %2728 = vmatmul.msk.f32.gmra.mxu2 %vm212_vm1, %v1797_v21  ;;  %2661 = vmatmul.msk.f32.gmra.mxu1 %vm212_vm1, %v941_v22  ;;  %v1833_v13 = vsel %vm1796_vm2, %v1704_v8, %v1736_v9  ;;  %v977_v14 = vsel %vm940_vm3, %v846_v10, %v878_v11  ;;  %v1619_v22 = vld [vmem:[%s4090_s0 + $0x78] sm:$0xff]  ;;  %v1769_v33 = vrot.slane %v1621_v32, 2  ;;  %v911_v34 = vrot.slane %v1621_v32, 1  ;;  %v3115_v63 = vld [vmem:[%s4090_s0 + $0x2e8] sm:$0xff]  ;;  %v3132_v8 = vld [vmem:[%s4090_s0 + $0x2f0] sm:$0xff] }
  0x11   :  { %v1801_v19 = vsel %vm1796_vm2, %v1736_v9, %v1768_v16  ;;  %v945_v21 = vsel %vm940_vm3, %v878_v11, %v910_v17  ;;  %v847_v26 = vrot.slane %v1619_v22, 1  ;;  %v1738_v42 = vrot.slane %v1623_v40, 2  ;;  %v1628_v11 = vld [vmem:[%s4090_s0 + $0xc0] sm:$0xff] }
  0x12   :  { %v1707_v58 = vrot.slane %v1625_v56, 2  ;;  %v881_v62 = vrot.slane %v1626_v57, 1  ;;  %v898_v15 = vrot.slane %v2873_v20, 1  ;;  %v3154_v16 = vld [vmem:[%s4091_s2] ss:$0 sm:$0xff]  ;;  %v1708_v17 = vrot.slane %v1628_v11, 2 }
  0x16   :  { %2643 = vmatmul.msk.f32.gmra.mxu3 %vm212_vm1, %v2893_v29  ;;  %2595 = vmatmul.msk.f32.gmra.mxu0 %vm212_vm1, %v1607_v23  ;;  %v1620_v23 = vld [vmem:[%s4090_s0 + $0x80] sm:$0xff] }
  0x17   :  { %v1737_v25 = vrot.slane %v1620_v23, 2  ;;  %v879_v27 = vrot.slane %v1620_v23, 1 }
  0x18   :  { %2729 = vmatmul.msk.f32.gmra.mxu2 %vm212_vm1, %v1830_v30  ;;  %2662 = vmatmul.msk.f32.gmra.mxu1 %vm212_vm1, %v974_v31 }
  0x19   :  { %v978_v31 = vsel %vm940_vm3, %v847_v26, %v879_v27 }
  0x1e   :  { %2644 = vmatmul.msk.f32.gmra.mxu3 %vm212_vm1, %v2910_v35  ;;  %2596 = vmatmul.msk.f32.gmra.mxu0 %vm212_vm1, %v1608_v24  ;;  %v1705_v24 = vrot.slane %v1619_v22, 2 }
  0x20   :  { %2730 = vmatmul.msk.f32.gmra.mxu2 %vm212_vm1, %v1798_v36  ;;  %2663 = vmatmul.msk.f32.gmra.mxu1 %vm212_vm1, %v942_v37  ;;  %v1834_v30 = vsel %vm1796_vm2, %v1705_v24, %v1737_v25  ;;  %v3058_v36 = vld [vmem:[%s4090_s0 + $0x2c0] sm:$0xff]  ;;  %v1802_v37 = vsel %vm1796_vm2, %v1737_v25, %v1769_v33 }
  0x26   :  { %2645 = vmatmul.msk.f32.gmra.mxu3 %vm212_vm1, %v2930_v44  ;;  %2597 = vmatmul.msk.f32.gmra.mxu0 %vm212_vm1, %v1610_v38  ;;  %v946_v38 = vsel %vm940_vm3, %v879_v27, %v911_v34 }
  0x28   :  { %2731 = vmatmul.msk.f32.gmra.mxu2 %vm212_vm1, %v1831_v45  ;;  %2664 = vmatmul.msk.f32.gmra.mxu1 %vm212_vm1, %v975_v46  ;;  %v880_v45 = vrot.slane %v1623_v40, 1  ;;  %v3078_v46 = vld [vmem:[%s4090_s0 + $0x2d0] sm:$0xff] }
  0x2e   :  { %2646 = vmatmul.msk.f32.gmra.mxu3 %vm212_vm1, %v2947_v50  ;;  %2598 = vmatmul.msk.f32.gmra.mxu0 %vm212_vm1, %v1611_v39  ;;  %v1622_v39 = vld [vmem:[%s4090_s0 + $0x90] sm:$0xff] }
  0x2f   :  { %v1706_v41 = vrot.slane %v1622_v39, 2  ;;  %v848_v43 = vrot.slane %v1622_v39, 1 }
  0x30   :  { %2732 = vmatmul.msk.f32.gmra.mxu2 %vm212_vm1, %v1799_v51  ;;  %2665 = vmatmul.msk.f32.gmra.mxu1 %vm212_vm1, %v943_v52  ;;  %v1770_v51 = vrot.slane %v1624_v49, 2  ;;  %v912_v52 = vrot.slane %v1624_v49, 1  ;;  %v1632_v49 = vld [vmem:[%s4090_s0 + $0xe0] sm:$0xff] }
  0x31   :  { %v1835_v47 = vsel %vm1796_vm2, %v1706_v41, %v1738_v42  ;;  %v979_v48 = vsel %vm940_vm3, %v848_v43, %v880_v45 }
  0x32   :  { %v947_v55 = vsel %vm940_vm3, %v880_v45, %v912_v52  ;;  %v899_v52 = vrot.slane %v2910_v35, 1 }
  0x36   :  { %2647 = vmatmul.msk.f32.gmra.mxu3 %vm212_vm1, %v2967_v59  ;;  %2599 = vmatmul.msk.f32.gmra.mxu0 %vm212_vm1, %v1613_v53  ;;  %v3095_v53 = vld [vmem:[%s4090_s0 + $0x2d8] sm:$0xff] }
  0x38   :  { %2733 = vmatmul.msk.f32.gmra.mxu2 %vm212_vm1, %v1832_v60  ;;  %2666 = vmatmul.msk.f32.gmra.mxu1 %vm212_vm1, %v976_v61  ;;  %v1739_v60 = vrot.slane %v1626_v57, 2  ;;  %v849_v61 = vrot.slane %v1625_v56, 1 }
  0x3a   :  { %v1836_v0 = vsel %vm1796_vm2, %v1707_v58, %v1739_v60 }
  0x3e   :  { %2648 = vmatmul.msk.f32.gmra.mxu3 %vm212_vm1, %v2984_v1  ;;  %2600 = vmatmul.msk.f32.gmra.mxu0 %vm212_vm1, %v1614_v54  ;;  %v1803_v54 = vsel %vm1796_vm2, %v1738_v42, %v1770_v51  ;;  %v867_v51 = vrot.slane %v2893_v29, 1  ;;  %v3207_v29 = vld [vmem:[%s4090_s0 + $0x268] sm:$0xff] }
  0x40   :  { %2734 = vmatmul.msk.f32.gmra.mxu2 %vm212_vm1, %v1800_v2  ;;  %2667 = vmatmul.msk.f32.gmra.mxu1 %vm212_vm1, %v944_v3  ;;  %v980_v2 = vsel %vm940_vm3, %v849_v61, %v881_v62  ;;  %v1627_v3 = vld [vmem:[%s4090_s0 + $0xb8] sm:$0xff] }
  0x46   :  { %2649 = vmatmul.msk.f32.gmra.mxu3 %vm212_vm1, %v3004_v12  ;;  %2601 = vmatmul.msk.f32.gmra.mxu0 %vm212_vm1, %v1616_v5  ;;  %v1771_v5 = vrot.slane %v1627_v3, 2 }
  0x48   :  { %2735 = vmatmul.msk.f32.gmra.mxu2 %vm212_vm1, %v1833_v13  ;;  %2668 = vmatmul.msk.f32.gmra.mxu1 %vm212_vm1, %v977_v14  ;;  %v1804_v9 = vsel %vm1796_vm2, %v1739_v60, %v1771_v5  ;;  %v1629_v13 = vld [vmem:[%s4090_s0 + $0xc8] sm:$0xff]  ;;  %v866_v14 = vrot.slane %v2833_v4, 1  ;;  %v3161_v4 = vld [vmem:[%s4090_s0 + $0x250] sm:$0xff]  ;;  %v883_v60 = vrot.slane %v1632_v49, 1 }
  0x4e   :  { %2650 = vmatmul.msk.f32.gmra.mxu3 %vm212_vm1, %v3021_v18  ;;  %2602 = vmatmul.msk.f32.gmra.mxu0 %vm212_vm1, %v1617_v6  ;;  %v913_v6 = vrot.slane %v1627_v3, 1 }
  0x50   :  { %2736 = vmatmul.msk.f32.gmra.mxu2 %vm212_vm1, %v1801_v19  ;;  %2669 = vmatmul.msk.f32.gmra.mxu1 %vm212_vm1, %v945_v21  ;;  %v948_v10 = vsel %vm940_vm3, %v881_v62, %v913_v6  ;;  %v1740_v19 = vrot.slane %v1629_v13, 2  ;;  %v850_v21 = vrot.slane %v1628_v11, 1  ;;  %v998_v62 = vsel %vm940_vm3, %v867_v51, %v899_v52  ;;  %v1636_v51 = vld [vmem:[%s4090_s0 + $0x100] sm:$0xff] }
  0x52   :  { %v1837_v25 = vsel %vm1796_vm2, %v1708_v17, %v1740_v19 }
  0x56   :  { %2651 = vmatmul.msk.f32.gmra.mxu3 %vm212_vm1, %v3041_v28  ;;  %2603 = vmatmul.msk.f32.gmra.mxu0 %vm212_vm1, %v1619_v22  ;;  %v882_v22 = vrot.slane %v1629_v13, 1 }
  0x58   :  { %2737 = vmatmul.msk.f32.gmra.mxu2 %vm212_vm1, %v1834_v30  ;;  %2670 = vmatmul.msk.f32.gmra.mxu1 %vm212_vm1, %v978_v31  ;;  %v981_v27 = vsel %vm940_vm3, %v850_v21, %v882_v22  ;;  %v1630_v30 = vld [vmem:[%s4090_s0 + $0xd0] sm:$0xff]  ;;  %v930_v31 = vrot.slane %v3161_v4, 1 }
  0x59   :  { %v1772_v34 = vrot.slane %v1630_v30, 2 }
  0x5b   :  { %v1805_v43 = vsel %vm1796_vm2, %v1740_v19, %v1772_v34 }
  0x5e   :  { %2652 = vmatmul.msk.f32.gmra.mxu3 %vm212_vm1, %v3058_v36  ;;  %2604 = vmatmul.msk.f32.gmra.mxu0 %vm212_vm1, %v1620_v23  ;;  %v997_v23 = vsel %vm940_vm3, %v866_v14, %v898_v15 }
  0x60   :  { %2738 = vmatmul.msk.f32.gmra.mxu2 %vm212_vm1, %v1802_v37  ;;  %2671 = vmatmul.msk.f32.gmra.mxu1 %vm212_vm1, %v946_v38  ;;  %v914_v37 = vrot.slane %v1630_v30, 1  ;;  %v868_v30 = vrot.slane %v2930_v44, 1  ;;  %v3256_v44 = vld [vmem:[%s4090_s0 + $0x280] sm:$0xff] }
  0x66   :  { %2653 = vmatmul.msk.f32.gmra.mxu3 %vm212_vm1, %v3078_v46  ;;  %2605 = vmatmul.msk.f32.gmra.mxu0 %vm212_vm1, %v1622_v39  ;;  %v965_v39 = vsel %vm940_vm3, %v898_v15, %v930_v31  ;;  %v900_v31 = vrot.slane %v2947_v50, 1 }
  0x68   :  { %2739 = vmatmul.msk.f32.gmra.mxu2 %vm212_vm1, %v1835_v47  ;;  %2672 = vmatmul.msk.f32.gmra.mxu1 %vm212_vm1, %v979_v48  ;;  %v949_v47 = vsel %vm940_vm3, %v882_v22, %v914_v37  ;;  %v1631_v48 = vld [vmem:[%s4090_s0 + $0xd8] sm:$0xff] }
  0x69   :  { %v851_v58 = vrot.slane %v1631_v48, 1 }
  0x6b   :  { %v982_v6 = vsel %vm940_vm3, %v851_v58, %v883_v60  ;;  %v916_v58 = vrot.slane %v1636_v51, 1 }
  0x6e   :  { %2654 = vmatmul.msk.f32.gmra.mxu3 %vm212_vm1, %v3095_v53  ;;  %2606 = vmatmul.msk.f32.gmra.mxu0 %vm212_vm1, %v1623_v40 }
  0x70   :  { %2740 = vmatmul.msk.f32.gmra.mxu2 %vm212_vm1, %v1803_v54  ;;  %2673 = vmatmul.msk.f32.gmra.mxu1 %vm212_vm1, %v947_v55 }
  0x76   :  { %2655 = vmatmul.msk.f32.gmra.mxu3 %vm212_vm1, %v3115_v63  ;;  %2607 = vmatmul.msk.f32.gmra.mxu0 %vm212_vm1, %v1625_v56  ;;  %v1709_v56 = vrot.slane %v1631_v48, 2 }
  0x78   :  { %2741 = vmatmul.msk.f32.gmra.mxu2 %vm212_vm1, %v1836_v0  ;;  %2674 = vmatmul.msk.f32.gmra.mxu1 %vm212_vm1, %v980_v2 }
  0x7e   :  { %2656 = vmatmul.msk.f32.gmra.mxu3 %vm212_vm1, %v3132_v8  ;;  %2608 = vmatmul.msk.f32.gmra.mxu0 %vm212_vm1, %v1626_v57  ;;  %v1741_v57 = vrot.slane %v1632_v49, 2 }
  0x80   :  { %2742 = vmatmul.msk.f32.gmra.mxu2 %vm212_vm1, %v1804_v9  ;;  %2675 = vmatmul.msk.f32.gmra.mxu1 %vm212_vm1, %v948_v10  ;;  %v1838_v3 = vsel %vm1796_vm2, %v1709_v56, %v1741_v57  ;;  %v1633_v9 = vld [vmem:[%s4090_s0 + $0xe8] sm:$0xff]  ;;  %v931_v10 = vrot.slane %v3207_v29, 1 }
  0x81   :  { %v1773_v14 = vrot.slane %v1633_v9, 2  ;;  %v915_v15 = vrot.slane %v1633_v9, 1  ;;  %v1638_v9 = vld [vmem:[%s4090_s0 + $0x110] sm:$0xff] }
  0x82   :  { %v966_v19 = vsel %vm940_vm3, %v899_v52, %v931_v10  ;;  %v932_v52 = vrot.slane %v3256_v44, 1  ;;  %v869_v10 = vrot.slane %v2967_v59, 1  ;;  %v3305_v59 = vld [vmem:[%s4090_s0 + $0x298] sm:$0xff] }
  0x83   :  { %v426_v24 = vpop.f32.mrf.mxu0 }
  0x84   :  { %v618_v20 = vadd.f32 %v3154_v16, %v426_v24  ;;  %v1806_v24 = vsel %vm1796_vm2, %v1741_v57, %v1773_v14  ;;  %v1774_v57 = vrot.slane %v1636_v51, 2  ;;  %v1640_v51 = vld [vmem:[%s4090_s0 + $0x120] sm:$0xff] }
  0x85   :  { %v1284_v26 = vpop.f32.mrf.mxu1 }
  0x86   :  { %2708 = vmatmul.msk.f32.vlgmr.msrb.gmra.mxu3 %vm212_vm1, %v997_v23  ;;  %2609 = vmatmul.msk.f32.gmra.mxu0 %vm212_vm1, %v1628_v11  ;;  %v1476_v32 = vadd.f32 %v1284_v26, %v618_v20  ;;  %v1634_v26 = vld [vmem:[%s4090_s0 + $0xf0] sm:$0xff] }
  0x87   :  { %v1710_v37 = vrot.slane %v1634_v26, 2 }
  0x88   :  { %2743 = vmatmul.msk.f32.gmra.mxu2 %vm212_vm1, %v1837_v25  ;;  %v3175_v33 = vpop.f32.mrf.mxu3  ;;  %2676 = vmatmul.msk.f32.gmra.mxu1 %vm212_vm1, %v981_v27  ;;  %v950_v25 = vsel %vm940_vm3, %v883_v60, %v915_v15  ;;  %v1635_v27 = vld [vmem:[%s4090_s0 + $0xf8] sm:$0xff] }
  0x8b   :  { %v2140_v38 = vpop.f32.mrf.mxu2  ;;  %v429_v41 = vpop.f32.mrf.mxu0 }
  0x8c   :  { %v2332_v40 = vadd.f32 %v2140_v38, %v1476_v32  ;;  %v619_v42 = vadd.f32 %v3154_v16, %v429_v41  ;;  %v1742_v38 = vrot.slane %v1635_v27, 2 }
  0x8d   :  { %v1287_v45 = vpop.f32.mrf.mxu1 }
  0x8e   :  { %2524 = vst [vmem:[%s4092_s3] sm:$0xff] %v2332_v40  ;;  %2709 = vmatmul.msk.f32.gmra.mxu3 %vm212_vm1, %v965_v39  ;;  %2610 = vmatmul.msk.f32.gmra.mxu0 %vm212_vm1, %v1629_v13  ;;  %v1477_v54 = vadd.f32 %v1287_v45, %v619_v42  ;;  %v852_v39 = vrot.slane %v1634_v26, 1  ;;  %v884_v40 = vrot.slane %v1635_v27, 1  ;;  %v999_v42 = vsel %vm940_vm3, %v868_v30, %v900_v31 }
  0x90   :  { %2744 = vmatmul.msk.f32.gmra.mxu2 %vm212_vm1, %v1805_v43  ;;  %2677 = vmatmul.msk.f32.gmra.mxu1 %vm212_vm1, %v949_v47  ;;  %v1839_v47 = vsel %vm1796_vm2, %v1710_v37, %v1742_v38 }
  0x91   :  { %v3199_v55 = vpop.f32.mrf.mxu3 }
  0x93   :  { %v2143_v61 = vpop.f32.mrf.mxu2  ;;  %v432_v2 = vpop.f32.mrf.mxu0 }
  0x94   :  { %v2333_v0 = vadd.f32 %v2143_v61, %v1477_v54  ;;  %v620_v35 = vadd.f32 %v3154_v16, %v432_v2  ;;  %v967_v61 = vsel %vm940_vm3, %v900_v31, %v932_v52  ;;  %v1639_v31 = vld [vmem:[%s4090_s0 + $0x118] sm:$0xff]  ;;  %v1641_v52 = vld [vmem:[%s4090_s0 + $0x128] sm:$0xff] }
  0x95   :  { %v1290_v5 = vpop.f32.mrf.mxu1 }
  0x96   :  { %2525 = vst [vmem:[%s4092_s3 + $0x8] sm:$0xff] %v2333_v0  ;;  %2710 = vmatmul.msk.f32.gmra.mxu3 %vm212_vm1, %v998_v62  ;;  %2611 = vmatmul.msk.f32.gmra.mxu0 %vm212_vm1, %v1631_v48  ;;  %v1478_v11 = vadd.f32 %v1290_v5, %v620_v35  ;;  %v1807_v35 = vsel %vm1796_vm2, %v1742_v38, %v1774_v57  ;;  %v902_v57 = vrot.slane %v3021_v18, 1 }
  0x97   :  { %v951_v5 = vsel %vm940_vm3, %v884_v40, %v916_v58 }
  0x98   :  { %2745 = vmatmul.msk.f32.gmra.mxu2 %vm212_vm1, %v1838_v3  ;;  %2678 = vmatmul.msk.f32.gmra.mxu1 %vm212_vm1, %v982_v6  ;;  %v1637_v6 = vld [vmem:[%s4090_s0 + $0x108] sm:$0xff] }
  0x99   :  { %v3224_v13 = vpop.f32.mrf.mxu3 }
  0x9b   :  { %v2146_v17 = vpop.f32.mrf.mxu2  ;;  %v435_v22 = vpop.f32.mrf.mxu0 }
  0x9c   :  { %v2334_v21 = vadd.f32 %v2146_v17, %v1478_v11  ;;  %v621_v23 = vadd.f32 %v3154_v16, %v435_v22  ;;  %v901_v11 = vrot.slane %v2984_v1, 1  ;;  %v1711_v17 = vrot.slane %v1637_v6, 2 }
  0x9d   :  { %v1293_v20 = vpop.f32.mrf.mxu1  ;;  %v885_v22 = vrot.slane %v1638_v9, 1 }
  0x9e   :  { %2526 = vst [vmem:[%s4092_s3 + $0x10] sm:$0xff] %v2334_v21  ;;  %2711 = vmatmul.msk.f32.gmra.mxu3 %vm212_vm1, %v966_v19  ;;  %2612 = vmatmul.msk.f32.gmra.mxu0 %vm212_vm1, %v1632_v49  ;;  %v1479_v32 = vadd.f32 %v1293_v20, %v621_v23  ;;  %v983_v49 = vsel %vm940_vm3, %v852_v39, %v884_v40  ;;  %v1743_v19 = vrot.slane %v1638_v9, 2  ;;  %v853_v21 = vrot.slane %v1637_v6, 1 }
  0x9f   :  { %v1775_v39 = vrot.slane %v1639_v31, 2  ;;  %v917_v40 = vrot.slane %v1639_v31, 1 }
  0xa0   :  { %2746 = vmatmul.msk.f32.gmra.mxu2 %vm212_vm1, %v1806_v24  ;;  %2679 = vmatmul.msk.f32.gmra.mxu1 %vm212_vm1, %v950_v25  ;;  %v1000_v24 = vsel %vm940_vm3, %v869_v10, %v901_v11  ;;  %v984_v30 = vsel %vm940_vm3, %v853_v21, %v885_v22 }
  0xa1   :  { %v3248_v34 = vpop.f32.mrf.mxu3 }
  0xa3   :  { %v2149_v41 = vpop.f32.mrf.mxu2  ;;  %v438_v45 = vpop.f32.mrf.mxu0 }
  0xa4   :  { %v2335_v43 = vadd.f32 %v2149_v41, %v1479_v32  ;;  %v622_v50 = vadd.f32 %v3154_v16, %v438_v45  ;;  %v933_v32 = vrot.slane %v3305_v59, 1 }
  0xa5   :  { %v1296_v48 = vpop.f32.mrf.mxu1 }
  0xa6   :  { %2527 = vst [vmem:[%s4092_s3 + $0x18] sm:$0xff] %v2335_v43  ;;  %2712 = vmatmul.msk.f32.gmra.mxu3 %vm212_vm1, %v999_v42  ;;  %2613 = vmatmul.msk.f32.gmra.mxu0 %vm212_vm1, %v1634_v26  ;;  %v1480_v54 = vadd.f32 %v1296_v48, %v622_v50  ;;  %v1840_v26 = vsel %vm1796_vm2, %v1711_v17, %v1743_v19 }
  0xa7   :  { %v968_v42 = vsel %vm940_vm3, %v901_v11, %v933_v32  ;;  %v1643_v32 = vld [vmem:[%s4090_s0 + $0x138] sm:$0xff] }
  0xa8   :  { %2747 = vmatmul.msk.f32.gmra.mxu2 %vm212_vm1, %v1839_v47  ;;  %2680 = vmatmul.msk.f32.gmra.mxu1 %vm212_vm1, %v983_v49  ;;  %v1808_v47 = vsel %vm1796_vm2, %v1743_v19, %v1775_v39  ;;  %v952_v49 = vsel %vm940_vm3, %v885_v22, %v917_v40  ;;  %v871_v39 = vrot.slane %v3041_v28, 1  ;;  %v903_v40 = vrot.slane %v3058_v36, 1  ;;  %v3403_v28 = vld [vmem:[%s4090_s0 + $0x2c8] sm:$0xff] }
  0xa9   :  { %v3273_v56 = vpop.f32.mrf.mxu3 }
  0xab   :  { %v2152_v60 = vpop.f32.mrf.mxu2  ;;  %v441_v0 = vpop.f32.mrf.mxu0 }
  0xac   :  { %v2336_v62 = vadd.f32 %v2152_v60, %v1480_v54  ;;  %v623_v2 = vadd.f32 %v3154_v16, %v441_v0  ;;  %v870_v54 = vrot.slane %v3004_v12, 1  ;;  %v854_v0 = vrot.slane %v1640_v51, 1  ;;  %v3354_v12 = vld [vmem:[%s4090_s0 + $0x2b0] sm:$0xff] }
  0xad   :  { %v1299_v3 = vpop.f32.mrf.mxu1  ;;  %v934_v17 = vrot.slane %v3354_v12, 1 }
  0xae   :  { %2528 = vst [vmem:[%s4092_s3 + $0x20] sm:$0xff] %v2336_v62  ;;  %2713 = vmatmul.msk.f32.gmra.mxu3 %vm212_vm1, %v967_v61  ;;  %2614 = vmatmul.msk.f32.gmra.mxu0 %vm212_vm1, %v1635_v27  ;;  %v1481_v14 = vadd.f32 %v1299_v3, %v623_v2  ;;  %v1712_v61 = vrot.slane %v1640_v51, 2  ;;  %v1744_v62 = vrot.slane %v1641_v52, 2  ;;  %v886_v2 = vrot.slane %v1641_v52, 1 }
  0xaf   :  { %v1001_v3 = vsel %vm940_vm3, %v870_v54, %v902_v57 }
  0xb0   :  { %2748 = vmatmul.msk.f32.gmra.mxu2 %vm212_vm1, %v1807_v35  ;;  %2681 = vmatmul.msk.f32.gmra.mxu1 %vm212_vm1, %v951_v5  ;;  %v985_v11 = vsel %vm940_vm3, %v854_v0, %v886_v2 }
  0xb1   :  { %v3297_v15 = vpop.f32.mrf.mxu3 }
  0xb3   :  { %v2155_v23 = vpop.f32.mrf.mxu2  ;;  %v444_v25 = vpop.f32.mrf.mxu0 }
  0xb4   :  { %v2337_v20 = vadd.f32 %v2155_v23, %v1481_v14  ;;  %v624_v1 = vadd.f32 %v3154_v16, %v444_v25  ;;  %v1642_v14 = vld [vmem:[%s4090_s0 + $0x130] sm:$0xff] }
  0xb5   :  { %v1302_v27 = vpop.f32.mrf.mxu1  ;;  %v1776_v22 = vrot.slane %v1642_v14, 2  ;;  %v918_v23 = vrot.slane %v1642_v14, 1 }
  0xb6   :  { %2529 = vst [vmem:[%s4092_s3 + $0x28] sm:$0xff] %v2337_v20  ;;  %2714 = vmatmul.msk.f32.gmra.mxu3 %vm212_vm1, %v1000_v24  ;;  %2615 = vmatmul.msk.f32.gmra.mxu0 %vm212_vm1, %v1637_v6  ;;  %v1482_v37 = vadd.f32 %v1302_v27, %v624_v1  ;;  %v969_v20 = vsel %vm940_vm3, %v902_v57, %v934_v17 }
  0xb7   :  { %v1809_v27 = vsel %vm1796_vm2, %v1744_v62, %v1776_v22  ;;  %v953_v31 = vsel %vm940_vm3, %v886_v2, %v918_v23  ;;  %v1647_v22 = vld [vmem:[%s4090_s0 + $0x158] sm:$0xff]  ;;  %v872_v23 = vrot.slane %v3078_v46, 1  ;;  %v3452_v46 = vld [vmem:[%s4090_s0 + $0x2e0] sm:$0xff] }
  0xb8   :  { %2749 = vmatmul.msk.f32.gmra.mxu2 %vm212_vm1, %v1840_v26  ;;  %2682 = vmatmul.msk.f32.gmra.mxu1 %vm212_vm1, %v984_v30 }
  0xb9   :  { %v3322_v38 = vpop.f32.mrf.mxu3 }
  0xbb   :  { %v2158_v41 = vpop.f32.mrf.mxu2  ;;  %v447_v45 = vpop.f32.mrf.mxu0 }
  0xbc   :  { %v2338_v43 = vadd.f32 %v2158_v41, %v1482_v37  ;;  %v625_v50 = vadd.f32 %v3154_v16, %v447_v45  ;;  %v1644_v37 = vld [vmem:[%s4090_s0 + $0x140] sm:$0xff] }
  0xbd   :  { %v1305_v48 = vpop.f32.mrf.mxu1  ;;  %v1745_v45 = vrot.slane %v1644_v37, 2 }
  0xbe   :  { %2530 = vst [vmem:[%s4092_s3 + $0x30] sm:$0xff] %v2338_v43  ;;  %2715 = vmatmul.msk.f32.gmra.mxu3 %vm212_vm1, %v968_v42  ;;  %2616 = vmatmul.msk.f32.gmra.mxu0 %vm212_vm1, %v1638_v9  ;;  %v1483_v58 = vadd.f32 %v1305_v48, %v625_v50  ;;  %v1841_v9 = vsel %vm1796_vm2, %v1712_v61, %v1744_v62  ;;  %v1713_v43 = vrot.slane %v1643_v32, 2  ;;  %v855_v50 = vrot.slane %v1643_v32, 1  ;;  %v1645_v61 = vld [vmem:[%s4090_s0 + $0x148] sm:$0xff] }
  0xbf   :  { %v935_v62 = vrot.slane %v3403_v28, 1 }
  0xc0   :  { %2750 = vmatmul.msk.f32.gmra.mxu2 %vm212_vm1, %v1808_v47  ;;  %2683 = vmatmul.msk.f32.gmra.mxu1 %vm212_vm1, %v952_v49  ;;  %v887_v47 = vrot.slane %v1644_v37, 1  ;;  %v1002_v49 = vsel %vm940_vm3, %v871_v39, %v903_v40  ;;  %v1842_v54 = vsel %vm1796_vm2, %v1713_v43, %v1745_v45 }
  0xc1   :  { %v3346_v60 = vpop.f32.mrf.mxu3 }
  0xc3   :  { %v2161_v35 = vpop.f32.mrf.mxu2  ;;  %v450_v6 = vpop.f32.mrf.mxu0 }
  0xc4   :  { %v2339_v5 = vadd.f32 %v2161_v35, %v1483_v58  ;;  %v626_v18 = vadd.f32 %v3154_v16, %v450_v6  ;;  %v986_v58 = vsel %vm940_vm3, %v855_v50, %v887_v47  ;;  %v1777_v35 = vrot.slane %v1645_v61, 2 }
  0xc5   :  { %v1308_v10 = vpop.f32.mrf.mxu1  ;;  %v970_v6 = vsel %vm940_vm3, %v903_v40, %v935_v62  ;;  %v936_v50 = vrot.slane %v3452_v46, 1 }
  0xc6   :  { %2531 = vst [vmem:[%s4092_s3 + $0x38] sm:$0xff] %v2339_v5  ;;  %2716 = vmatmul.msk.f32.gmra.mxu3 %vm212_vm1, %v1001_v3  ;;  %2617 = vmatmul.msk.f32.gmra.mxu0 %vm212_vm1, %v1640_v51  ;;  %v1484_v19 = vadd.f32 %v1308_v10, %v626_v18  ;;  %v919_v3 = vrot.slane %v1645_v61, 1 }
  0xc8   :  { %2751 = vmatmul.msk.f32.gmra.mxu2 %vm212_vm1, %v1841_v9  ;;  %2684 = vmatmul.msk.f32.gmra.mxu1 %vm212_vm1, %v985_v11  ;;  %v1810_v11 = vsel %vm1796_vm2, %v1745_v45, %v1777_v35  ;;  %v954_v17 = vsel %vm940_vm3, %v887_v47, %v919_v3  ;;  %v1648_v45 = vld [vmem:[%s4090_s0 + $0x160] sm:$0xff]  ;;  %v1649_v35 = vld [vmem:[%s4090_s0 + $0x168] sm:$0xff]  ;;  %v1650_v3 = vld [vmem:[%s4090_s0 + $0x170] sm:$0xff] }
  0xc9   :  { %v3371_v21 = vpop.f32.mrf.mxu3 }
  0xcb   :  { %v2164_v24 = vpop.f32.mrf.mxu2  ;;  %v453_v1 = vpop.f32.mrf.mxu0 }
  0xcc   :  { %v2340_v25 = vadd.f32 %v2164_v24, %v1484_v19  ;;  %v627_v26 = vadd.f32 %v3154_v16, %v453_v1  ;;  %v1646_v19 = vld [vmem:[%s4090_s0 + $0x150] sm:$0xff]  ;;  %v904_v24 = vrot.slane %v3095_v53, 1 }
  0xcd   :  { %v1311_v30 = vpop.f32.mrf.mxu1  ;;  %v1714_v1 = vrot.slane %v1646_v19, 2 }
  0xce   :  { %2532 = vst [vmem:[%s4092_s3 + $0x40] sm:$0xff] %v2340_v25  ;;  %2717 = vmatmul.msk.f32.gmra.mxu3 %vm212_vm1, %v969_v20  ;;  %2618 = vmatmul.msk.f32.gmra.mxu0 %vm212_vm1, %v1641_v52  ;;  %v1485_v41 = vadd.f32 %v1311_v30, %v627_v26  ;;  %v1746_v26 = vrot.slane %v1647_v22, 2  ;;  %v888_v30 = vrot.slane %v1647_v22, 1 }
  0xd0   :  { %2752 = vmatmul.msk.f32.gmra.mxu2 %vm212_vm1, %v1809_v27  ;;  %2685 = vmatmul.msk.f32.gmra.mxu1 %vm212_vm1, %v953_v31  ;;  %v856_v27 = vrot.slane %v1646_v19, 1  ;;  %v1843_v40 = vsel %vm1796_vm2, %v1714_v1, %v1746_v26 }
  0xd1   :  { %v3395_v42 = vpop.f32.mrf.mxu3 }
  0xd2   :  { %v987_v43 = vsel %vm940_vm3, %v856_v27, %v888_v30  ;;  %v1651_v27 = vld [vmem:[%s4090_s0 + $0x178] sm:$0xff] }
  0xd3   :  { %v2167_v48 = vpop.f32.mrf.mxu2  ;;  %v456_v52 = vpop.f32.mrf.mxu0 }
  0xd4   :  { %v2341_v51 = vadd.f32 %v2167_v48, %v1485_v41  ;;  %v628_v36 = vadd.f32 %v3154_v16, %v456_v52 }
  0xd5   :  { %v1314_v57 = vpop.f32.mrf.mxu1 }
  0xd6   :  { %2533 = vst [vmem:[%s4092_s3 + $0x48] sm:$0xff] %v2341_v51  ;;  %2718 = vmatmul.msk.f32.gmra.mxu3 %vm212_vm1, %v1002_v49  ;;  %2619 = vmatmul.msk.f32.gmra.mxu0 %vm212_vm1, %v1643_v32  ;;  %v1486_v0 = vadd.f32 %v1314_v57, %v628_v36  ;;  %v1003_v32 = vsel %vm940_vm3, %v872_v23, %v904_v24  ;;  %v1778_v49 = vrot.slane %v1648_v45, 2  ;;  %v920_v51 = vrot.slane %v1648_v45, 1  ;;  %v1676_v45 = vld [vmem:[%s4090_s0 + $0x240] sm:$0xff] }
  0xd7   :  { %v971_v36 = vsel %vm940_vm3, %v904_v24, %v936_v50  ;;  %v1677_v50 = vld [vmem:[%s4090_s0 + $0x248] sm:$0xff] }
  0xd8   :  { %2753 = vmatmul.msk.f32.gmra.mxu2 %vm212_vm1, %v1842_v54  ;;  %2686 = vmatmul.msk.f32.gmra.mxu1 %vm212_vm1, %v986_v58  ;;  %v1811_v61 = vsel %vm1796_vm2, %v1746_v26, %v1778_v49 }
  0xd9   :  { %v3420_v2 = vpop.f32.mrf.mxu3 }
  0xdb   :  { %v2170_v5 = vpop.f32.mrf.mxu2  ;;  %v459_v9 = vpop.f32.mrf.mxu0 }
  0xdc   :  { %v2342_v18 = vadd.f32 %v2170_v5, %v1486_v0  ;;  %v629_v10 = vadd.f32 %v3154_v16, %v459_v9  ;;  %v955_v0 = vsel %vm940_vm3, %v888_v30, %v920_v51  ;;  %v873_v5 = vrot.slane %v3115_v63, 1  ;;  %v3501_v63 = vld [vmem:[%s4090_s0 + $0x2f8] sm:$0xff] }
  0xdd   :  { %v1317_v14 = vpop.f32.mrf.mxu1  ;;  %v937_v30 = vrot.slane %v3501_v63, 1 }
  0xde   :  { %2534 = vst [vmem:[%s4092_s3 + $0x50] sm:$0xff] %v2342_v18  ;;  %2719 = vmatmul.msk.f32.gmra.mxu3 %vm212_vm1, %v970_v6  ;;  %2620 = vmatmul.msk.f32.gmra.mxu0 %vm212_vm1, %v1644_v37  ;;  %v1487_v20 = vadd.f32 %v1317_v14, %v629_v10  ;;  %v905_v6 = vrot.slane %v3132_v8, 1  ;;  %v1715_v10 = vrot.slane %v1649_v35, 2  ;;  %v857_v14 = vrot.slane %v1649_v35, 1 }
  0xe0   :  { %2754 = vmatmul.msk.f32.gmra.mxu2 %vm212_vm1, %v1810_v11  ;;  %2687 = vmatmul.msk.f32.gmra.mxu1 %vm212_vm1, %v954_v17  ;;  %v1747_v11 = vrot.slane %v1650_v3, 2  ;;  %v889_v17 = vrot.slane %v1650_v3, 1  ;;  %v1004_v23 = vsel %vm940_vm3, %v873_v5, %v905_v6 }
  0xe1   :  { %v3444_v25 = vpop.f32.mrf.mxu3 }
  0xe2   :  { %v988_v26 = vsel %vm940_vm3, %v857_v14, %v889_v17 }
  0xe3   :  { %v2173_v31 = vpop.f32.mrf.mxu2  ;;  %v462_v39 = vpop.f32.mrf.mxu0 }
  0xe4   :  { %v2343_v37 = vadd.f32 %v2173_v31, %v1487_v20  ;;  %v630_v53 = vadd.f32 %v3154_v16, %v462_v39  ;;  %v1844_v20 = vsel %vm1796_vm2, %v1715_v10, %v1747_v11  ;;  %v921_v39 = vrot.slane %v1651_v27, 1 }
  0xe5   :  { %v1320_v41 = vpop.f32.mrf.mxu1 }
  0xe6   :  { %2535 = vst [vmem:[%s4092_s3 + $0x58] sm:$0xff] %v2343_v37  ;;  %2720 = vmatmul.msk.f32.gmra.mxu3 %vm212_vm1, %v1003_v32  ;;  %2621 = vmatmul.msk.f32.gmra.mxu0 %vm212_vm1, %v1646_v19  ;;  %v1488_v47 = vadd.f32 %v1320_v41, %v630_v53  ;;  %v1779_v37 = vrot.slane %v1651_v27, 2 }
  0xe8   :  { %2755 = vmatmul.msk.f32.gmra.mxu2 %vm212_vm1, %v1843_v40  ;;  %2688 = vmatmul.msk.f32.gmra.mxu1 %vm212_vm1, %v987_v43  ;;  %v972_v40 = vsel %vm940_vm3, %v905_v6, %v937_v30  ;;  %v1812_v49 = vsel %vm1796_vm2, %v1747_v11, %v1779_v37 }
  0xe9   :  { %v3469_v48 = vpop.f32.mrf.mxu3 }
  0xeb   :  { %v2176_v52 = vpop.f32.mrf.mxu2  ;;  %v465_v57 = vpop.f32.mrf.mxu0 }
  0xec   :  { %v2344_v54 = vadd.f32 %v2176_v52, %v1488_v47  ;;  %v631_v58 = vadd.f32 %v3154_v16, %v465_v57  ;;  %v956_v52 = vsel %vm940_vm3, %v889_v17, %v921_v39  ;;  %v1724_v57 = vrot.slane %v1676_v45, 2 }
  0xed   :  { %v1323_v62 = vpop.f32.mrf.mxu1 }
  0xee   :  { %2536 = vst [vmem:[%s4092_s3 + $0x60] sm:$0xff] %v2344_v54  ;;  %2721 = vmatmul.msk.f32.gmra.mxu3 %vm212_vm1, %v971_v36  ;;  %2622 = vmatmul.msk.f32.gmra.mxu0 %vm212_vm1, %v1647_v22  ;;  %v1489_v18 = vadd.f32 %v1323_v62, %v631_v58  ;;  %v1652_v36 = vld [vmem:[%s4090_s0 + $0x180] sm:$0xff]  ;;  %v1653_v54 = vld [vmem:[%s4090_s0 + $0x188] sm:$0xff]  ;;  %v1756_v58 = vrot.slane %v1677_v50, 2  ;;  %v1655_v50 = vld [vmem:[%s4090_s0 + $0x198] sm:$0xff] }
  0xef   :  { %v858_v5 = vrot.slane %v1652_v36, 1  ;;  %v890_v6 = vrot.slane %v1653_v54, 1 }
  0xf0   :  { %2756 = vmatmul.msk.f32.gmra.mxu2 %vm212_vm1, %v1811_v61  ;;  %2689 = vmatmul.msk.f32.gmra.mxu1 %vm212_vm1, %v955_v0  ;;  %v1716_v0 = vrot.slane %v1652_v36, 2  ;;  %v1853_v10 = vsel %vm1796_vm2, %v1724_v57, %v1756_v58 }
  0xf1   :  { %v3493_v9 = vpop.f32.mrf.mxu3 }
  0xf3   :  { %v2179_v19 = vpop.f32.mrf.mxu2  ;;  %v468_v24 = vpop.f32.mrf.mxu0 }
  0xf4   :  { %v2345_v22 = vadd.f32 %v2179_v19, %v1489_v18  ;;  %v632_v8 = vadd.f32 %v3154_v16, %v468_v24  ;;  %v1788_v24 = vrot.slane %v3161_v4, 2  ;;  %v1679_v4 = vld [vmem:[%s4090_s0 + $0x258] sm:$0xff] }
  0xf5   :  { %v1326_v1 = vpop.f32.mrf.mxu1 }
  0xf6   :  { %2537 = vst [vmem:[%s4092_s3 + $0x68] sm:$0xff] %v2345_v22  ;;  %2722 = vmatmul.msk.f32.gmra.mxu3 %vm212_vm1, %v1004_v23  ;;  %2623 = vmatmul.msk.f32.gmra.mxu0 %vm212_vm1, %v1649_v35  ;;  %v1490_v31 = vadd.f32 %v1326_v1, %v632_v8  ;;  %v1748_v35 = vrot.slane %v1653_v54, 2  ;;  %v989_v23 = vsel %vm940_vm3, %v858_v5, %v890_v6  ;;  %v1654_v22 = vld [vmem:[%s4090_s0 + $0x190] sm:$0xff] }
  0xf7   :  { %v666_v8 = vadd.f32 %v3154_v16, %v3175_v33  ;;  %v922_v30 = vrot.slane %v1654_v22, 1  ;;  %v1821_v37 = vsel %vm1796_vm2, %v1756_v58, %v1788_v24  ;;  %v1680_v33 = vld [vmem:[%s4090_s0 + $0x260] sm:$0xff]  ;;  %v1717_v58 = vrot.slane %v1655_v50, 2 }
  0xf8   :  { %2757 = vmatmul.msk.f32.gmra.mxu2 %vm212_vm1, %v1844_v20  ;;  %2690 = vmatmul.msk.f32.gmra.mxu1 %vm212_vm1, %v988_v26  ;;  %v1845_v17 = vsel %vm1796_vm2, %v1716_v0, %v1748_v35  ;;  %v1780_v26 = vrot.slane %v1654_v22, 2 }
  0xf9   :  { %v3518_v32 = vpop.f32.mrf.mxu3  ;;  %v957_v45 = vsel %vm940_vm3, %v890_v6, %v922_v30 }
  0xfb   :  { %v2182_v53 = vpop.f32.mrf.mxu2  ;;  %v471_v43 = vpop.f32.mrf.mxu0 }
  0xfc   :  { %v2346_v41 = vadd.f32 %v2182_v53, %v1490_v31  ;;  %v633_v47 = vadd.f32 %v3154_v16, %v471_v43 }
  0xfd   :  { %v1329_v51 = vpop.f32.mrf.mxu1 }
  0xfe   :  { %2538 = vst [vmem:[%s4092_s3 + $0x70] sm:$0xff] %v2346_v41  ;;  %2723 = vmatmul.msk.f32.gmra.mxu3 %vm212_vm1, %v972_v40  ;;  %2624 = vmatmul.msk.f32.gmra.mxu0 %vm212_vm1, %v1650_v3  ;;  %v1491_v61 = vadd.f32 %v1329_v51, %v633_v47  ;;  %v1813_v41 = vsel %vm1796_vm2, %v1748_v35, %v1780_v26  ;;  %v1656_v47 = vld [vmem:[%s4090_s0 + $0x1a0] sm:$0xff]  ;;  %v1757_v51 = vrot.slane %v1680_v33, 2  ;;  %v859_v35 = vrot.slane %v1655_v50, 1 }
  0xff   :  { %v891_v5 = vrot.slane %v1656_v47, 1 }
 0x100   :  { %2758 = vmatmul.msk.f32.gmra.mxu2 %vm212_vm1, %v1812_v49  ;;  %2691 = vmatmul.msk.f32.gmra.mxu1 %vm212_vm1, %v956_v52  ;;  %v1725_v49 = vrot.slane %v1679_v4, 2  ;;  %v667_v52 = vadd.f32 %v3154_v16, %v3199_v55 }
 0x101   :  { %v3546_v62 = vpop.f32.mrf.mxu3 }
 0x103   :  { %v2185_v18 = vpop.f32.mrf.mxu2  ;;  %v474_v14 = vpop.f32.mrf.mxu0 }
 0x104   :  { %v2347_v11 = vadd.f32 %v2185_v18, %v1491_v61  ;;  %v634_v3 = vadd.f32 %v3154_v16, %v474_v14  ;;  %v1749_v61 = vrot.slane %v1656_v47, 2 }
 0x105   :  { %v1332_v19 = vpop.f32.mrf.mxu1 }
 0x106   :  { %2539 = vst [vmem:[%s4092_s3 + $0x78] sm:$0xff] %v2347_v11  ;;  %2775 = vmatmul.msk.f32.vlgmr.msra.gmra.mxu3 %vm212_vm1, %v1853_v10  ;;  %2625 = vmatmul.msk.f32.gmra.mxu0 %vm212_vm1, %v1652_v36  ;;  %v1492_v20 = vadd.f32 %v1332_v19, %v634_v3  ;;  %v1846_v11 = vsel %vm1796_vm2, %v1717_v58, %v1749_v61  ;;  %v1789_v19 = vrot.slane %v3207_v29, 2  ;;  %v1682_v29 = vld [vmem:[%s4090_s0 + $0x270] sm:$0xff] }
 0x107   :  { %v990_v3 = vsel %vm940_vm3, %v859_v35, %v891_v5 }
 0x108   :  { %2759 = vmatmul.msk.f32.gmra.mxu2 %vm212_vm1, %v1845_v17  ;;  %2692 = vmatmul.msk.f32.gmra.mxu1 %vm212_vm1, %v989_v23  ;;  %v1657_v17 = vld [vmem:[%s4090_s0 + $0x1a8] sm:$0xff]  ;;  %v668_v23 = vadd.f32 %v3154_v16, %v3224_v13  ;;  %v1822_v30 = vsel %vm1796_vm2, %v1757_v51, %v1789_v19  ;;  %v1683_v13 = vld [vmem:[%s4090_s0 + $0x278] sm:$0xff] }
 0x109   :  { %v1428_v1 = vpop.f32.mrf.mxu3 }
 0x10a   :  { %v3569_v27 = vadd.f32 %v1428_v1, %v666_v8  ;;  %v1781_v8 = vrot.slane %v1657_v17, 2  ;;  %v923_v1 = vrot.slane %v1657_v17, 1 }
 0x10b   :  { %v2188_v31 = vpop.f32.mrf.mxu2  ;;  %v477_v53 = vpop.f32.mrf.mxu0 }
 0x10c   :  { %v2348_v39 = vadd.f32 %v2188_v31, %v1492_v20  ;;  %v635_v40 = vadd.f32 %v3154_v16, %v477_v53  ;;  %v1814_v53 = vsel %vm1796_vm2, %v1749_v61, %v1781_v8  ;;  %v958_v33 = vsel %vm940_vm3, %v891_v5, %v923_v1 }
 0x10d   :  { %v1335_v43 = vpop.f32.mrf.mxu1 }
 0x10e   :  { %2540 = vst [vmem:[%s4092_s3 + $0x80] sm:$0xff] %v2348_v39  ;;  %2776 = vmatmul.msk.f32.gmra.mxu3 %vm212_vm1, %v1821_v37  ;;  %2626 = vmatmul.msk.f32.gmra.mxu0 %vm212_vm1, %v1653_v54  ;;  %v1493_v36 = vadd.f32 %v1335_v43, %v635_v40  ;;  %v1854_v54 = vsel %vm1796_vm2, %v1725_v49, %v1757_v51  ;;  %v1658_v40 = vld [vmem:[%s4090_s0 + $0x1b0] sm:$0xff]  ;;  %v1726_v43 = vrot.slane %v1682_v29, 2 }
 0x10f   :  { %v860_v58 = vrot.slane %v1658_v40, 1 }
 0x110   :  { %2760 = vmatmul.msk.f32.gmra.mxu2 %vm212_vm1, %v1813_v41  ;;  %2693 = vmatmul.msk.f32.gmra.mxu1 %vm212_vm1, %v957_v45  ;;  %v1659_v41 = vld [vmem:[%s4090_s0 + $0x1b8] sm:$0xff]  ;;  %v1758_v45 = vrot.slane %v1683_v13, 2  ;;  %v1661_v13 = vld [vmem:[%s4090_s0 + $0x1c8] sm:$0xff] }
 0x111   :  { %v1431_v57 = vpop.f32.mrf.mxu3  ;;  %v892_v61 = vrot.slane %v1659_v41, 1 }
 0x112   :  { %v3599_v0 = vadd.f32 %v1431_v57, %v667_v52  ;;  %v1718_v52 = vrot.slane %v1658_v40, 2 }
 0x113   :  { %v2191_v6 = vpop.f32.mrf.mxu2  ;;  %v480_v10 = vpop.f32.mrf.mxu0 }
 0x114   :  { %v2349_v18 = vadd.f32 %v2191_v6, %v1493_v36  ;;  %v636_v55 = vadd.f32 %v3154_v16, %v480_v10  ;;  %v1750_v36 = vrot.slane %v1659_v41, 2  ;;  %v991_v10 = vsel %vm940_vm3, %v860_v58, %v892_v61 }
 0x115   :  { %v1338_v14 = vpop.f32.mrf.mxu1 }
 0x116   :  { %2541 = vst [vmem:[%s4092_s3 + $0x88] sm:$0xff] %v2349_v18  ;;  %2777 = vmatmul.msk.f32.gmra.mxu3 %vm212_vm1, %v1854_v54  ;;  %2627 = vmatmul.msk.f32.gmra.mxu0 %vm212_vm1, %v1655_v50  ;;  %v1494_v22 = vadd.f32 %v1338_v14, %v636_v55  ;;  %v669_v50 = vadd.f32 %v3154_v16, %v3248_v34  ;;  %v1660_v55 = vld [vmem:[%s4090_s0 + $0x1c0] sm:$0xff] }
 0x117   :  { %v1847_v54 = vsel %vm1796_vm2, %v1718_v52, %v1750_v36  ;;  %v670_v14 = vadd.f32 %v3154_v16, %v3273_v56  ;;  %v1782_v19 = vrot.slane %v1660_v55, 2  ;;  %v1686_v56 = vld [vmem:[%s4090_s0 + $0x290] sm:$0xff] }
 0x118   :  { %2761 = vmatmul.msk.f32.gmra.mxu2 %vm212_vm1, %v1846_v11  ;;  %2694 = vmatmul.msk.f32.gmra.mxu1 %vm212_vm1, %v990_v3  ;;  %v1790_v11 = vrot.slane %v3256_v44, 2  ;;  %v1685_v44 = vld [vmem:[%s4090_s0 + $0x288] sm:$0xff] }
 0x119   :  { %v1434_v24 = vpop.f32.mrf.mxu3 }
 0x11a   :  { %v3621_v20 = vadd.f32 %v1434_v24, %v668_v23  ;;  %v1823_v8 = vsel %vm1796_vm2, %v1758_v45, %v1790_v11 }
 0x11b   :  { %v2194_v26 = vpop.f32.mrf.mxu2  ;;  %v483_v37 = vpop.f32.mrf.mxu0 }
 0x11c   :  { %v2350_v31 = vadd.f32 %v2194_v26, %v1494_v22  ;;  %v637_v39 = vadd.f32 %v3154_v16, %v483_v37  ;;  %v924_v22 = vrot.slane %v1660_v55, 1 }
 0x11d   :  { %v1341_v4 = vpop.f32.mrf.mxu1 }
 0x11e   :  { %2542 = vst [vmem:[%s4092_s3 + $0x90] sm:$0xff] %v2350_v31  ;;  %2778 = vmatmul.msk.f32.gmra.mxu3 %vm212_vm1, %v1822_v30  ;;  %2628 = vmatmul.msk.f32.gmra.mxu0 %vm212_vm1, %v1656_v47  ;;  %v1495_v49 = vadd.f32 %v1341_v4, %v637_v39  ;;  %v1855_v47 = vsel %vm1796_vm2, %v1726_v43, %v1758_v45  ;;  %v1662_v39 = vld [vmem:[%s4090_s0 + $0x1d0] sm:$0xff]  ;;  %v1759_v4 = vrot.slane %v1686_v56, 2  ;;  %v1719_v45 = vrot.slane %v1661_v13, 2  ;;  %v1665_v56 = vld [vmem:[%s4090_s0 + $0x1e8] sm:$0xff] }
 0x11f   :  { %v1815_v31 = vsel %vm1796_vm2, %v1750_v36, %v1782_v19  ;;  %v959_v29 = vsel %vm940_vm3, %v892_v61, %v924_v22  ;;  %v893_v52 = vrot.slane %v1662_v39, 1 }
 0x120   :  { %2762 = vmatmul.msk.f32.gmra.mxu2 %vm212_vm1, %v1814_v53  ;;  %2695 = vmatmul.msk.f32.gmra.mxu1 %vm212_vm1, %v958_v33  ;;  %v1727_v53 = vrot.slane %v1685_v44, 2  ;;  %v671_v33 = vadd.f32 %v3154_v16, %v3297_v15  ;;  %v1664_v44 = vld [vmem:[%s4090_s0 + $0x1e0] sm:$0xff] }
 0x121   :  { %v1437_v51 = vpop.f32.mrf.mxu3 }
 0x122   :  { %v3651_v57 = vadd.f32 %v1437_v51, %v669_v50  ;;  %v1751_v50 = vrot.slane %v1662_v39, 2  ;;  %v861_v51 = vrot.slane %v1661_v13, 1 }
 0x123   :  { %v2197_v35 = vpop.f32.mrf.mxu2  ;;  %v486_v6 = vpop.f32.mrf.mxu0 }
 0x124   :  { %v2351_v5 = vadd.f32 %v2197_v35, %v1495_v49  ;;  %v638_v34 = vadd.f32 %v3154_v16, %v486_v6  ;;  %v1848_v35 = vsel %vm1796_vm2, %v1719_v45, %v1751_v50  ;;  %v1663_v6 = vld [vmem:[%s4090_s0 + $0x1d8] sm:$0xff] }
 0x125   :  { %v1344_v18 = vpop.f32.mrf.mxu1  ;;  %v1783_v55 = vrot.slane %v1663_v6, 2 }
 0x126   :  { %2543 = vst [vmem:[%s4092_s3 + $0x98] sm:$0xff] %v2351_v5  ;;  %2779 = vmatmul.msk.f32.gmra.mxu3 %vm212_vm1, %v1855_v47  ;;  %2629 = vmatmul.msk.f32.gmra.mxu0 %vm212_vm1, %v1658_v40  ;;  %v1496_v3 = vadd.f32 %v1344_v18, %v638_v34  ;;  %v992_v5 = vsel %vm940_vm3, %v861_v51, %v893_v52  ;;  %v1791_v34 = vrot.slane %v3305_v59, 2  ;;  %v1689_v59 = vld [vmem:[%s4090_s0 + $0x2a8] sm:$0xff] }
 0x128   :  { %2763 = vmatmul.msk.f32.gmra.mxu2 %vm212_vm1, %v1847_v54  ;;  %2696 = vmatmul.msk.f32.gmra.mxu1 %vm212_vm1, %v991_v10  ;;  %v672_v54 = vadd.f32 %v3154_v16, %v3322_v38  ;;  %v3738_v38 = vld [vmem:[%s4091_s2] ss:$0 sm:$0xff] }
 0x129   :  { %v1440_v17 = vpop.f32.mrf.mxu3 }
 0x12a   :  { %v3673_v23 = vadd.f32 %v1440_v17, %v670_v14  ;;  %v925_v14 = vrot.slane %v1663_v6, 1  ;;  %v1824_v17 = vsel %vm1796_vm2, %v1759_v4, %v1791_v34 }
 0x12b   :  { %v2200_v24 = vpop.f32.mrf.mxu2  ;;  %v489_v26 = vpop.f32.mrf.mxu0 }
 0x12c   :  { %v2352_v1 = vadd.f32 %v2200_v24, %v1496_v3  ;;  %v639_v30 = vadd.f32 %v3154_v16, %v489_v26  ;;  %v960_v26 = vsel %vm940_vm3, %v893_v52, %v925_v14 }
 0x12d   :  { %v1347_v37 = vpop.f32.mrf.mxu1 }
 0x12e   :  { %2544 = vst [vmem:[%s4092_s3 + $0xa0] sm:$0xff] %v2352_v1  ;;  %2780 = vmatmul.msk.f32.gmra.mxu3 %vm212_vm1, %v1823_v8  ;;  %2630 = vmatmul.msk.f32.gmra.mxu0 %vm212_vm1, %v1659_v41  ;;  %v1497_v40 = vadd.f32 %v1347_v37, %v639_v30  ;;  %v1856_v41 = vsel %vm1796_vm2, %v1727_v53, %v1759_v4  ;;  %v1720_v53 = vrot.slane %v1664_v44, 2  ;;  %v1752_v4 = vrot.slane %v1665_v56, 2 }
 0x12f   :  { %v1816_v8 = vsel %vm1796_vm2, %v1751_v50, %v1783_v55  ;;  %v673_v37 = vadd.f32 %v3738_v38, %v3346_v60 }
 0x130   :  { %2764 = vmatmul.msk.f32.gmra.mxu2 %vm212_vm1, %v1815_v31  ;;  %2697 = vmatmul.msk.f32.gmra.mxu1 %vm212_vm1, %v959_v29  ;;  %v1760_v31 = vrot.slane %v1689_v59, 2  ;;  %v1849_v52 = vsel %vm1796_vm2, %v1720_v53, %v1752_v4 }
 0x131   :  { %v1443_v43 = vpop.f32.mrf.mxu3 }
 0x132   :  { %v3703_v49 = vadd.f32 %v1443_v43, %v671_v33  ;;  %v894_v43 = vrot.slane %v1665_v56, 1 }
 0x133   :  { %v2203_v36 = vpop.f32.mrf.mxu2  ;;  %v492_v61 = vpop.f32.mrf.mxu0 }
 0x134   :  { %v2353_v58 = vadd.f32 %v2203_v36, %v1497_v40  ;;  %v640_v15 = vadd.f32 %v3154_v16, %v492_v61  ;;  %v1688_v16 = vld [vmem:[%s4090_s0 + $0x2a0] sm:$0xff]  ;;  %v862_v40 = vrot.slane %v1664_v44, 1  ;;  %v1792_v61 = vrot.slane %v3354_v12, 2  ;;  %v1691_v12 = vld [vmem:[%s4090_s0 + $0x2b8] sm:$0xff] }
 0x135   :  { %v1350_v47 = vpop.f32.mrf.mxu1  ;;  %v1728_v30 = vrot.slane %v1688_v16, 2  ;;  %v1668_v16 = vld [vmem:[%s4090_s0 + $0x200] sm:$0xff]  ;;  %v1729_v59 = vrot.slane %v1691_v12, 2 }
 0x136   :  { %2545 = vst [vmem:[%s4092_s3 + $0xa8] sm:$0xff] %v2353_v58  ;;  %2781 = vmatmul.msk.f32.gmra.mxu3 %vm212_vm1, %v1856_v41  ;;  %2631 = vmatmul.msk.f32.gmra.mxu0 %vm212_vm1, %v1661_v13  ;;  %v1498_v18 = vadd.f32 %v1350_v47, %v640_v15  ;;  %v993_v41 = vsel %vm940_vm3, %v862_v40, %v894_v43  ;;  %v1666_v58 = vld [vmem:[%s4090_s0 + $0x1f0] sm:$0xff] }
 0x137   :  { %v674_v15 = vadd.f32 %v3738_v38, %v3371_v21  ;;  %v926_v34 = vrot.slane %v1666_v58, 1  ;;  %v1692_v21 = vld [vmem:[%s4090_s0 + $0x2c0] sm:$0xff] }
 0x138   :  { %2765 = vmatmul.msk.f32.gmra.mxu2 %vm212_vm1, %v1848_v35  ;;  %2698 = vmatmul.msk.f32.gmra.mxu1 %vm212_vm1, %v992_v5  ;;  %v1784_v5 = vrot.slane %v1666_v58, 2 }
 0x139   :  { %v1446_v10 = vpop.f32.mrf.mxu3 }
 0x13a   :  { %v3725_v11 = vadd.f32 %v1446_v10, %v672_v54 }
 0x13b   :  { %v2206_v3 = vpop.f32.mrf.mxu2  ;;  %v495_v22 = vpop.f32.mrf.mxu0 }
 0x13c   :  { %v2354_v19 = vadd.f32 %v2206_v3, %v1498_v18  ;;  %v641_v24 = vadd.f32 %v3738_v38, %v495_v22  ;;  %v1825_v18 = vsel %vm1796_vm2, %v1760_v31, %v1792_v61  ;;  %v1817_v3 = vsel %vm1796_vm2, %v1752_v4, %v1784_v5  ;;  %v1667_v22 = vld [vmem:[%s4090_s0 + $0x1f8] sm:$0xff] }
 0x13d   :  { %v1353_v1 = vpop.f32.mrf.mxu1 }
 0x13e   :  { %2546 = vst [vmem:[%s4092_s3 + $0xb0] sm:$0xff] %v2354_v19  ;;  %2782 = vmatmul.msk.f32.gmra.mxu3 %vm212_vm1, %v1824_v17  ;;  %2632 = vmatmul.msk.f32.gmra.mxu0 %vm212_vm1, %v1662_v39  ;;  %v1499_v29 = vadd.f32 %v1353_v1, %v641_v24  ;;  %v1857_v39 = vsel %vm1796_vm2, %v1728_v30, %v1760_v31  ;;  %v1761_v24 = vrot.slane %v1692_v21, 2  ;;  %v1753_v30 = vrot.slane %v1668_v16, 2 }
 0x13f   :  { %v961_v19 = vsel %vm940_vm3, %v894_v43, %v926_v34 }
 0x140   :  { %2766 = vmatmul.msk.f32.gmra.mxu2 %vm212_vm1, %v1816_v8  ;;  %2699 = vmatmul.msk.f32.gmra.mxu1 %vm212_vm1, %v960_v26  ;;  %v675_v8 = vadd.f32 %v3738_v38, %v3395_v42 }
 0x141   :  { %v1449_v13 = vpop.f32.mrf.mxu3 }
 0x142   :  { %v3760_v33 = vadd.f32 %v1449_v13, %v673_v37  ;;  %v863_v37 = vrot.slane %v1667_v22, 1 }
 0x143   :  { %v2209_v45 = vpop.f32.mrf.mxu2  ;;  %v498_v51 = vpop.f32.mrf.mxu0 }
 0x144   :  { %v2355_v50 = vadd.f32 %v2209_v45, %v1499_v29  ;;  %v642_v60 = vadd.f32 %v3738_v38, %v498_v51  ;;  %v895_v29 = vrot.slane %v1668_v16, 1  ;;  %v676_v51 = vadd.f32 %v3738_v38, %v3420_v2  ;;  %v1695_v2 = vld [vmem:[%s4090_s0 + $0x2d8] sm:$0xff] }
 0x145   :  { %v1356_v36 = vpop.f32.mrf.mxu1  ;;  %v1762_v21 = vrot.slane %v1695_v2, 2  ;;  %v679_v2 = vadd.f32 %v3738_v38, %v3493_v9 }
 0x146   :  { %2547 = vst [vmem:[%s4092_s3 + $0xb8] sm:$0xff] %v2355_v50  ;;  %2783 = vmatmul.msk.f32.gmra.mxu3 %vm212_vm1, %v1857_v39  ;;  %2633 = vmatmul.msk.f32.gmra.mxu0 %vm212_vm1, %v1664_v44  ;;  %v1500_v35 = vadd.f32 %v1356_v36, %v642_v60  ;;  %v1721_v44 = vrot.slane %v1667_v22, 2  ;;  %v994_v45 = vsel %vm940_vm3, %v863_v37, %v895_v29  ;;  %v1669_v39 = vld [vmem:[%s4090_s0 + $0x208] sm:$0xff]  ;;  %v1793_v50 = vrot.slane %v3403_v28, 2  ;;  %v1694_v28 = vld [vmem:[%s4090_s0 + $0x2d0] sm:$0xff] }
 0x147   :  { %v1785_v36 = vrot.slane %v1669_v39, 2  ;;  %v927_v58 = vrot.slane %v1669_v39, 1  ;;  %v1730_v12 = vrot.slane %v1694_v28, 2 }
 0x148   :  { %2767 = vmatmul.msk.f32.gmra.mxu2 %vm212_vm1, %v1849_v52  ;;  %2700 = vmatmul.msk.f32.gmra.mxu1 %vm212_vm1, %v993_v41  ;;  %v1850_v40 = vsel %vm1796_vm2, %v1721_v44, %v1753_v30 }
 0x149   :  { %v1452_v47 = vpop.f32.mrf.mxu3  ;;  %v1818_v34 = vsel %vm1796_vm2, %v1753_v30, %v1785_v36 }
 0x14a   :  { %v3782_v6 = vadd.f32 %v1452_v47, %v674_v15  ;;  %v1826_v15 = vsel %vm1796_vm2, %v1761_v24, %v1793_v50 }
 0x14b   :  { %v2212_v54 = vpop.f32.mrf.mxu2  ;;  %v501_v55 = vpop.f32.mrf.mxu0 }
 0x14c   :  { %v2356_v10 = vadd.f32 %v2212_v54, %v1500_v35  ;;  %v643_v14 = vadd.f32 %v3738_v38, %v501_v55  ;;  %v1671_v55 = vld [vmem:[%s4090_s0 + $0x218] sm:$0xff] }
 0x14d   :  { %v1359_v17 = vpop.f32.mrf.mxu1 }
 0x14e   :  { %2548 = vst [vmem:[%s4092_s3 + $0xc0] sm:$0xff] %v2356_v10  ;;  %2784 = vmatmul.msk.f32.gmra.mxu3 %vm212_vm1, %v1825_v18  ;;  %2634 = vmatmul.msk.f32.gmra.mxu0 %vm212_vm1, %v1665_v56  ;;  %v1501_v1 = vadd.f32 %v1359_v17, %v643_v14  ;;  %v1858_v56 = vsel %vm1796_vm2, %v1729_v59, %v1761_v24  ;;  %v1670_v10 = vld [vmem:[%s4090_s0 + $0x210] sm:$0xff] }
 0x14f   :  { %v962_v18 = vsel %vm940_vm3, %v895_v29, %v927_v58  ;;  %v677_v14 = vadd.f32 %v3738_v38, %v3444_v25  ;;  %v864_v24 = vrot.slane %v1670_v10, 1 }
 0x150   :  { %2768 = vmatmul.msk.f32.gmra.mxu2 %vm212_vm1, %v1817_v3  ;;  %2701 = vmatmul.msk.f32.gmra.mxu1 %vm212_vm1, %v961_v19  ;;  %v1722_v19 = vrot.slane %v1670_v10, 2 }
 0x151   :  { %v1455_v26 = vpop.f32.mrf.mxu3 }
 0x152   :  { %v3812_v31 = vadd.f32 %v1455_v26, %v675_v8  ;;  %v896_v8 = vrot.slane %v1671_v55, 1 }
 0x153   :  { %v2215_v13 = vpop.f32.mrf.mxu2  ;;  %v504_v4 = vpop.f32.mrf.mxu0 }
 0x154   :  { %v2357_v53 = vadd.f32 %v2215_v13, %v1501_v1  ;;  %v644_v42 = vadd.f32 %v3738_v38, %v504_v4  ;;  %v995_v29 = vsel %vm940_vm3, %v864_v24, %v896_v8  ;;  %v1672_v13 = vld [vmem:[%s4090_s0 + $0x220] sm:$0xff] }
 0x155   :  { %v1362_v43 = vpop.f32.mrf.mxu1 }
 0x156   :  { %2549 = vst [vmem:[%s4092_s3 + $0xc8] sm:$0xff] %v2357_v53  ;;  %2785 = vmatmul.msk.f32.gmra.mxu3 %vm212_vm1, %v1858_v56  ;;  %2635 = vmatmul.msk.f32.gmra.mxu0 %vm212_vm1, %v1667_v22  ;;  %v1502_v60 = vadd.f32 %v1362_v43, %v644_v42  ;;  %v1754_v22 = vrot.slane %v1671_v55, 2  ;;  %v1794_v56 = vrot.slane %v3452_v46, 2  ;;  %v678_v53 = vadd.f32 %v3738_v38, %v3469_v48  ;;  %v1697_v46 = vld [vmem:[%s4090_s0 + $0x2e8] sm:$0xff]  ;;  %v1698_v48 = vld [vmem:[%s4090_s0 + $0x2f0] sm:$0xff] }
 0x157   :  { %v1763_v28 = vrot.slane %v1698_v48, 2 }
 0x158   :  { %2769 = vmatmul.msk.f32.gmra.mxu2 %vm212_vm1, %v1850_v40  ;;  %2702 = vmatmul.msk.f32.gmra.mxu1 %vm212_vm1, %v994_v45  ;;  %v1851_v30 = vsel %vm1796_vm2, %v1722_v19, %v1754_v22  ;;  %v1786_v40 = vrot.slane %v1672_v13, 2  ;;  %v928_v45 = vrot.slane %v1672_v13, 1  ;;  %v1827_v50 = vsel %vm1796_vm2, %v1762_v21, %v1794_v56 }
 0x159   :  { %v1458_v52 = vpop.f32.mrf.mxu3 }
 0x15a   :  { %v3834_v41 = vadd.f32 %v1458_v52, %v676_v51  ;;  %v1819_v36 = vsel %vm1796_vm2, %v1754_v22, %v1786_v40  ;;  %v681_v40 = vadd.f32 %v3738_v38, %v3546_v62 }
 0x15b   :  { %v2218_v61 = vpop.f32.mrf.mxu2  ;;  %v507_v47 = vpop.f32.mrf.mxu0 }
 0x15c   :  { %v2358_v35 = vadd.f32 %v2218_v61, %v1502_v60  ;;  %v645_v5 = vadd.f32 %v3738_v38, %v507_v47  ;;  %v963_v61 = vsel %vm940_vm3, %v896_v8, %v928_v45  ;;  %v1731_v47 = vrot.slane %v1697_v46, 2  ;;  %v1675_v8 = vld [vmem:[%s4090_s0 + $0x238] sm:$0xff] }
 0x15d   :  { %v1365_v54 = vpop.f32.mrf.mxu1 }
 0x15e   :  { %2550 = vst [vmem:[%s4092_s3 + $0xd0] sm:$0xff] %v2358_v35  ;;  %2786 = vmatmul.msk.f32.gmra.mxu3 %vm212_vm1, %v1826_v15  ;;  %2636 = vmatmul.msk.f32.gmra.mxu0 %vm212_vm1, %v1668_v16  ;;  %v1503_v3 = vadd.f32 %v1365_v54, %v645_v5  ;;  %v1859_v16 = vsel %vm1796_vm2, %v1730_v12, %v1762_v21  ;;  %v1673_v15 = vld [vmem:[%s4090_s0 + $0x228] sm:$0xff]  ;;  %v1674_v35 = vld [vmem:[%s4090_s0 + $0x230] sm:$0xff] }
 0x15f   :  { %v1723_v54 = vrot.slane %v1673_v15, 2  ;;  %v865_v12 = vrot.slane %v1673_v15, 1  ;;  %v897_v21 = vrot.slane %v1674_v35, 1 }
 0x160   :  { %2770 = vmatmul.msk.f32.gmra.mxu2 %vm212_vm1, %v1818_v34  ;;  %2703 = vmatmul.msk.f32.gmra.mxu1 %vm212_vm1, %v962_v18  ;;  %v1755_v18 = vrot.slane %v1674_v35, 2 }
 0x161   :  { %v1461_v17 = vpop.f32.mrf.mxu3  ;;  %v996_v24 = vsel %vm940_vm3, %v865_v12, %v897_v21 }
 0x162   :  { %v3864_v59 = vadd.f32 %v1461_v17, %v677_v14  ;;  %v1852_v19 = vsel %vm1796_vm2, %v1723_v54, %v1755_v18 }
 0x163   :  { %v2221_v1 = vpop.f32.mrf.mxu2  ;;  %v510_v44 = vpop.f32.mrf.mxu0 }
 0x164   :  { %v2359_v26 = vadd.f32 %v2221_v1, %v1503_v3  ;;  %v646_v25 = vadd.f32 %v3738_v38, %v510_v44  ;;  %v1795_v1 = vrot.slane %v3501_v63, 2 }
 0x165   :  { %v1368_v37 = vpop.f32.mrf.mxu1 }
 0x166   :  { %2551 = vst [vmem:[%s4092_s3 + $0xd8] sm:$0xff] %v2359_v26  ;;  %2787 = vmatmul.msk.f32.gmra.mxu3 %vm212_vm1, %v1859_v16  ;;  %2637 = vmatmul.msk.f32.gmra.mxu0 %vm212_vm1, %v1670_v10  ;;  %v1504_v4 = vadd.f32 %v1368_v37, %v646_v25  ;;  %v680_v16 = vadd.f32 %v3738_v38, %v3518_v32  ;;  %v1787_v25 = vrot.slane %v1675_v8, 2  ;;  %v929_v37 = vrot.slane %v1675_v8, 1 }
 0x167   :  { %v1828_v13 = vsel %vm1796_vm2, %v1763_v28, %v1795_v1 }
 0x168   :  { %2771 = vmatmul.msk.f32.gmra.mxu2 %vm212_vm1, %v1851_v30  ;;  %2704 = vmatmul.msk.f32.gmra.mxu1 %vm212_vm1, %v995_v29  ;;  %v1820_v32 = vsel %vm1796_vm2, %v1755_v18, %v1787_v25 }
 0x169   :  { %v1464_v42 = vpop.f32.mrf.mxu3 }
 0x16a   :  { %v3886_v43 = vadd.f32 %v1464_v42, %v678_v53  ;;  %v964_v42 = vsel %vm940_vm3, %v897_v21, %v929_v37 }
 0x16b   :  { %v2224_v39 = vpop.f32.mrf.mxu2  ;;  %v513_v60 = vpop.f32.mrf.mxu0 }
 0x16c   :  { %v2360_v51 = vadd.f32 %v2224_v39, %v1504_v4  ;;  %v647_v52 = vadd.f32 %v3738_v38, %v513_v60 }
 0x16d   :  { %v1371_v58 = vpop.f32.mrf.mxu1 }
 0x16e   :  { %2552 = vst [vmem:[%s4092_s3 + $0xe0] sm:$0xff] %v2360_v51  ;;  %2788 = vmatmul.msk.f32.gmra.mxu3 %vm212_vm1, %v1827_v50  ;;  %2638 = vmatmul.msk.f32.gmra.mxu0 %vm212_vm1, %v1671_v55  ;;  %v1505_v5 = vadd.f32 %v1371_v58, %v647_v52  ;;  %v1860_v55 = vsel %vm1796_vm2, %v1731_v47, %v1763_v28 }
 0x170   :  { %2772 = vmatmul.msk.f32.gmra.mxu2 %vm212_vm1, %v1819_v36  ;;  %2705 = vmatmul.msk.f32.gmra.mxu1 %vm212_vm1, %v963_v61 }
 0x171   :  { %v1467_v34 = vpop.f32.mrf.mxu3 }
 0x172   :  { %v3916_v10 = vadd.f32 %v1467_v34, %v679_v2 }
 0x173   :  { %v2227_v14 = vpop.f32.mrf.mxu2  ;;  %v516_v17 = vpop.f32.mrf.mxu0 }
 0x174   :  { %v2361_v3 = vadd.f32 %v2227_v14, %v1505_v5  ;;  %v648_v9 = vadd.f32 %v3738_v38, %v516_v17 }
 0x175   :  { %v1374_v22 = vpop.f32.mrf.mxu1 }
 0x176   :  { %2553 = vst [vmem:[%s4092_s3 + $0xe8] sm:$0xff] %v2361_v3  ;;  %2789 = vmatmul.msk.f32.gmra.mxu3 %vm212_vm1, %v1860_v55  ;;  %2639 = vmatmul.msk.f32.gmra.mxu0 %vm212_vm1, %v1673_v15  ;;  %v1506_v26 = vadd.f32 %v1374_v22, %v648_v9 }
 0x178   :  { %2773 = vmatmul.msk.f32.gmra.mxu2 %vm212_vm1, %v1852_v19  ;;  %2706 = vmatmul.msk.f32.gmra.mxu1 %vm212_vm1, %v996_v24 }
 0x179   :  { %v1470_v44 = vpop.f32.mrf.mxu3 }
 0x17a   :  { %v3938_v30 = vadd.f32 %v1470_v44, %v680_v16 }
 0x17b   :  { %v2230_v29 = vpop.f32.mrf.mxu2  ;;  %v519_v53 = vpop.f32.mrf.mxu0 }
 0x17c   :  { %v2362_v56 = vadd.f32 %v2230_v29, %v1506_v26  ;;  %v649_v63 = vadd.f32 %v3738_v38, %v519_v53 }
 0x17d   :  { %v1377_v4 = vpop.f32.mrf.mxu1 }
 0x17e   :  { %2554 = vst [vmem:[%s4092_s3 + $0xf0] sm:$0xff] %v2362_v56  ;;  %2790 = vmatmul.msk.f32.gmra.mxu3 %vm212_vm1, %v1828_v13  ;;  %2640 = vmatmul.msk.f32.gmra.mxu0 %vm212_vm1, %v1674_v35  ;;  %v1507_v45 = vadd.f32 %v1377_v4, %v649_v63 }
 0x180   :  { %2774 = vmatmul.msk.f32.gmra.mxu2 %vm212_vm1, %v1820_v32  ;;  %2707 = vmatmul.msk.f32.gmra.mxu1 %vm212_vm1, %v964_v42 }
 0x181   :  { %v1473_v39 = vpop.f32.mrf.mxu3 }
 0x182   :  { %v3956_v50 = vadd.f32 %v1473_v39, %v681_v40 }
 0x183   :  { %v2233_v51 = vpop.f32.mrf.mxu2  ;;  %v522_v46 = vpop.f32.mrf.mxu0 }
 0x184   :  { %v2363_v60 = vadd.f32 %v2233_v51, %v1507_v45  ;;  %v650_v48 = vadd.f32 %v3738_v38, %v522_v46 }
 0x185   :  { %v1380_v7 = vpop.f32.mrf.mxu1 }
 0x186   :  { %2555 = vst [vmem:[%s4092_s3 + $0xf8] sm:$0xff] %v2363_v60  ;;  %v1508_v52 = vadd.f32 %v1380_v7, %v650_v48 }
 0x189   :  { %v2284_v62 = vpop.f32.mrf.mxu3 }
 0x18a   :  { %v2380_v36 = vadd.f32 %v2284_v62, %v3569_v27 }
 0x18b   :  { %v2236_v58 = vpop.f32.mrf.mxu2  ;;  %v525_v15 = vpop.f32.mrf.mxu0 }
 0x18c   :  { %2572 = vst [vmem:[%s4092_s3 + $0x180] sm:$0xff] %v2380_v36  ;;  %v2364_v61 = vadd.f32 %v2236_v58, %v1508_v52  ;;  %v651_v35 = vadd.f32 %v3738_v38, %v525_v15 }
 0x18d   :  { %v1383_v47 = vpop.f32.mrf.mxu1 }
 0x18e   :  { %2556 = vst [vmem:[%s4092_s3 + $0x100] sm:$0xff] %v2364_v61  ;;  %v1509_v28 = vadd.f32 %v1383_v47, %v651_v35 }
 0x191   :  { %v2287_v2 = vpop.f32.mrf.mxu3 }
 0x192   :  { %v2381_v5 = vadd.f32 %v2287_v2, %v3599_v0 }
 0x193   :  { %v2239_v34 = vpop.f32.mrf.mxu2  ;;  %v528_v54 = vpop.f32.mrf.mxu0 }
 0x194   :  { %2573 = vst [vmem:[%s4092_s3 + $0x188] sm:$0xff] %v2381_v5  ;;  %v2365_v27 = vadd.f32 %v2239_v34, %v1509_v28  ;;  %v652_v18 = vadd.f32 %v3738_v38, %v528_v54 }
 0x195   :  { %v1386_v12 = vpop.f32.mrf.mxu1 }
 0x196   :  { %2557 = vst [vmem:[%s4092_s3 + $0x108] sm:$0xff] %v2365_v27  ;;  %v1510_v21 = vadd.f32 %v1386_v12, %v652_v18 }
 0x199   :  { %v2290_v14 = vpop.f32.mrf.mxu3 }
 0x19a   :  { %v2382_v55 = vadd.f32 %v2290_v14, %v3621_v20 }
 0x19b   :  { %v2242_v3 = vpop.f32.mrf.mxu2  ;;  %v531_v17 = vpop.f32.mrf.mxu0 }
 0x19c   :  { %2574 = vst [vmem:[%s4092_s3 + $0x190] sm:$0xff] %v2382_v55  ;;  %v2366_v0 = vadd.f32 %v2242_v3, %v1510_v21  ;;  %v653_v9 = vadd.f32 %v3738_v38, %v531_v17 }
 0x19d   :  { %v1389_v19 = vpop.f32.mrf.mxu1 }
 0x19e   :  { %2558 = vst [vmem:[%s4092_s3 + $0x110] sm:$0xff] %v2366_v0  ;;  %v1511_v22 = vadd.f32 %v1389_v19, %v653_v9 }
 0x1a1   :  { %v2293_v24 = vpop.f32.mrf.mxu3 }
 0x1a2   :  { %v2383_v8 = vadd.f32 %v2293_v24, %v3651_v57 }
 0x1a3   :  { %v2245_v1 = vpop.f32.mrf.mxu2  ;;  %v534_v16 = vpop.f32.mrf.mxu0 }
 0x1a4   :  { %2575 = vst [vmem:[%s4092_s3 + $0x198] sm:$0xff] %v2383_v8  ;;  %v2367_v20 = vadd.f32 %v2245_v1, %v1511_v22  ;;  %v654_v26 = vadd.f32 %v3738_v38, %v534_v16 }
 0x1a5   :  { %v1392_v44 = vpop.f32.mrf.mxu1 }
 0x1a6   :  { %2559 = vst [vmem:[%s4092_s3 + $0x118] sm:$0xff] %v2367_v20  ;;  %v1512_v25 = vadd.f32 %v1392_v44, %v654_v26 }
 0x1a9   :  { %v2296_v37 = vpop.f32.mrf.mxu3 }
 0x1aa   :  { %v2384_v29 = vadd.f32 %v2296_v37, %v3673_v23 }
 0x1ab   :  { %v2248_v13 = vpop.f32.mrf.mxu2  ;;  %v537_v56 = vpop.f32.mrf.mxu0 }
 0x1ac   :  { %2576 = vst [vmem:[%s4092_s3 + $0x1a0] sm:$0xff] %v2384_v29  ;;  %v2368_v57 = vadd.f32 %v2248_v13, %v1512_v25  ;;  %v655_v53 = vadd.f32 %v3738_v38, %v537_v56 }
 0x1ad   :  { %v1395_v63 = vpop.f32.mrf.mxu1 }
 0x1ae   :  { %2560 = vst [vmem:[%s4092_s3 + $0x120] sm:$0xff] %v2368_v57  ;;  %v1513_v32 = vadd.f32 %v1395_v63, %v655_v53 }
 0x1b1   :  { %v2299_v4 = vpop.f32.mrf.mxu3 }
 0x1b2   :  { %v2385_v42 = vadd.f32 %v2299_v4, %v3703_v49 }
 0x1b3   :  { %v2251_v40 = vpop.f32.mrf.mxu2  ;;  %v540_v45 = vpop.f32.mrf.mxu0 }
 0x1b4   :  { %2577 = vst [vmem:[%s4092_s3 + $0x1a8] sm:$0xff] %v2385_v42  ;;  %v2369_v23 = vadd.f32 %v2251_v40, %v1513_v32  ;;  %v656_v39 = vadd.f32 %v3738_v38, %v540_v45 }
 0x1b5   :  { %v1398_v51 = vpop.f32.mrf.mxu1 }
 0x1b6   :  { %2561 = vst [vmem:[%s4092_s3 + $0x128] sm:$0xff] %v2369_v23  ;;  %v1514_v60 = vadd.f32 %v1398_v51, %v656_v39 }
 0x1b9   :  { %v2302_v46 = vpop.f32.mrf.mxu3 }
 0x1ba   :  { %v2386_v48 = vadd.f32 %v2302_v46, %v3725_v11 }
 0x1bb   :  { %v2254_v7 = vpop.f32.mrf.mxu2  ;;  %v543_v52 = vpop.f32.mrf.mxu0 }
 0x1bc   :  { %2578 = vst [vmem:[%s4092_s3 + $0x1b0] sm:$0xff] %v2386_v48  ;;  %v2370_v49 = vadd.f32 %v2254_v7, %v1514_v60  ;;  %v657_v62 = vadd.f32 %v3738_v38, %v543_v52 }
 0x1bd   :  { %v1401_v36 = vpop.f32.mrf.mxu1 }
 0x1be   :  { %2562 = vst [vmem:[%s4092_s3 + $0x130] sm:$0xff] %v2370_v49  ;;  %v1515_v58 = vadd.f32 %v1401_v36, %v657_v62 }
 0x1c1   :  { %v2305_v61 = vpop.f32.mrf.mxu3 }
 0x1c2   :  { %v2387_v15 = vadd.f32 %v2305_v61, %v3760_v33 }
 0x1c3   :  { %v2257_v35 = vpop.f32.mrf.mxu2  ;;  %v546_v47 = vpop.f32.mrf.mxu0 }
 0x1c4   :  { %2579 = vst [vmem:[%s4092_s3 + $0x1b8] sm:$0xff] %v2387_v15  ;;  %v2371_v11 = vadd.f32 %v2257_v35, %v1515_v58  ;;  %v658_v28 = vadd.f32 %v3738_v38, %v546_v47 }
 0x1c5   :  { %v1404_v2 = vpop.f32.mrf.mxu1 }
 0x1c6   :  { %2563 = vst [vmem:[%s4092_s3 + $0x138] sm:$0xff] %v2371_v11  ;;  %v1516_v5 = vadd.f32 %v1404_v2, %v658_v28 }
 0x1c9   :  { %v2308_v34 = vpop.f32.mrf.mxu3 }
 0x1ca   :  { %v2388_v27 = vadd.f32 %v2308_v34, %v3782_v6 }
 0x1cb   :  { %v2260_v54 = vpop.f32.mrf.mxu2  ;;  %v549_v18 = vpop.f32.mrf.mxu0 }
 0x1cc   :  { %2580 = vst [vmem:[%s4092_s3 + $0x1c0] sm:$0xff] %v2388_v27  ;;  %v2372_v33 = vadd.f32 %v2260_v54, %v1516_v5  ;;  %v659_v12 = vadd.f32 %v3738_v38, %v549_v18 }
 0x1cd   :  { %v1407_v21 = vpop.f32.mrf.mxu1 }
 0x1ce   :  { %2564 = vst [vmem:[%s4092_s3 + $0x140] sm:$0xff] %v2372_v33  ;;  %v1517_v14 = vadd.f32 %v1407_v21, %v659_v12 }
 0x1d1   :  { %v2311_v55 = vpop.f32.mrf.mxu3 }
 0x1d2   :  { %v2389_v3 = vadd.f32 %v2311_v55, %v3812_v31 }
 0x1d3   :  { %v2263_v0 = vpop.f32.mrf.mxu2  ;;  %v552_v17 = vpop.f32.mrf.mxu0 }
 0x1d4   :  { %2581 = vst [vmem:[%s4092_s3 + $0x1c8] sm:$0xff] %v2389_v3  ;;  %v2373_v6 = vadd.f32 %v2263_v0, %v1517_v14  ;;  %v660_v9 = vadd.f32 %v3738_v38, %v552_v17 }
 0x1d5   :  { %v1410_v19 = vpop.f32.mrf.mxu1 }
 0x1d6   :  { %2565 = vst [vmem:[%s4092_s3 + $0x148] sm:$0xff] %v2373_v6  ;;  %v1518_v22 = vadd.f32 %v1410_v19, %v660_v9 }
 0x1d9   :  { %v2314_v24 = vpop.f32.mrf.mxu3 }
 0x1da   :  { %v2390_v8 = vadd.f32 %v2314_v24, %v3834_v41 }
 0x1db   :  { %v2266_v1 = vpop.f32.mrf.mxu2  ;;  %v555_v20 = vpop.f32.mrf.mxu0 }
 0x1dc   :  { %2582 = vst [vmem:[%s4092_s3 + $0x1d0] sm:$0xff] %v2390_v8  ;;  %v2374_v31 = vadd.f32 %v2266_v1, %v1518_v22  ;;  %v661_v16 = vadd.f32 %v3738_v38, %v555_v20 }
 0x1dd   :  { %v1413_v26 = vpop.f32.mrf.mxu1 }
 0x1de   :  { %2566 = vst [vmem:[%s4092_s3 + $0x150] sm:$0xff] %v2374_v31  ;;  %v1519_v44 = vadd.f32 %v1413_v26, %v661_v16 }
 0x1e1   :  { %v2317_v25 = vpop.f32.mrf.mxu3 }
 0x1e2   :  { %v2391_v37 = vadd.f32 %v2317_v25, %v3864_v59 }
 0x1e3   :  { %v2269_v29 = vpop.f32.mrf.mxu2  ;;  %v558_v13 = vpop.f32.mrf.mxu0 }
 0x1e4   :  { %2583 = vst [vmem:[%s4092_s3 + $0x1d8] sm:$0xff] %v2391_v37  ;;  %v2375_v41 = vadd.f32 %v2269_v29, %v1519_v44  ;;  %v662_v57 = vadd.f32 %v3738_v38, %v558_v13 }
 0x1e5   :  { %v1416_v56 = vpop.f32.mrf.mxu1 }
 0x1e6   :  { %2567 = vst [vmem:[%s4092_s3 + $0x158] sm:$0xff] %v2375_v41  ;;  %v1520_v53 = vadd.f32 %v1416_v56, %v662_v57 }
 0x1e9   :  { %v2320_v63 = vpop.f32.mrf.mxu3 }
 0x1ea   :  { %v2392_v32 = vadd.f32 %v2320_v63, %v3886_v43 }
 0x1eb   :  { %v2272_v4 = vpop.f32.mrf.mxu2  ;;  %v561_v42 = vpop.f32.mrf.mxu0 }
 0x1ec   :  { %2584 = vst [vmem:[%s4092_s3 + $0x1e0] sm:$0xff] %v2392_v32  ;;  %v2376_v59 = vadd.f32 %v2272_v4, %v1520_v53  ;;  %v663_v40 = vadd.f32 %v3738_v38, %v561_v42 }
 0x1ed   :  { %v1419_v23 = vpop.f32.mrf.mxu1 }
 0x1ee   :  { %2568 = vst [vmem:[%s4092_s3 + $0x160] sm:$0xff] %v2376_v59  ;;  %v1521_v45 = vadd.f32 %v1419_v23, %v663_v40 }
 0x1f1   :  { %v2323_v39 = vpop.f32.mrf.mxu3 }
 0x1f2   :  { %v2393_v51 = vadd.f32 %v2323_v39, %v3916_v10 }
 0x1f3   :  { %v2275_v60 = vpop.f32.mrf.mxu2  ;;  %v564_v46 = vpop.f32.mrf.mxu0 }
 0x1f4   :  { %2585 = vst [vmem:[%s4092_s3 + $0x1e8] sm:$0xff] %v2393_v51  ;;  %v2377_v43 = vadd.f32 %v2275_v60, %v1521_v45  ;;  %v664_v48 = vadd.f32 %v3738_v38, %v564_v46 }
 0x1f5   :  { %v1422_v7 = vpop.f32.mrf.mxu1 }
 0x1f6   :  { %2569 = vst [vmem:[%s4092_s3 + $0x168] sm:$0xff] %v2377_v43  ;;  %v1522_v49 = vadd.f32 %v1422_v7, %v664_v48 }
 0x1f9   :  { %v2326_v52 = vpop.f32.mrf.mxu3 }
 0x1fa   :  { %v2394_v62 = vadd.f32 %v2326_v52, %v3938_v30 }
 0x1fb   :  { %v2278_v36 = vpop.f32.mrf.mxu2  ;;  %v567_v58 = vpop.f32.mrf.mxu0 }
 0x1fc   :  { %2586 = vst [vmem:[%s4092_s3 + $0x1f0] sm:$0xff] %v2394_v62  ;;  %v2378_v10 = vadd.f32 %v2278_v36, %v1522_v49  ;;  %v665_v61 = vadd.f32 %v3738_v38, %v567_v58 }
 0x1fd   :  { %v1425_v15 = vpop.f32.mrf.mxu1 }
 0x1fe   :  { %2570 = vst [vmem:[%s4092_s3 + $0x170] sm:$0xff] %v2378_v10  ;;  %v1523_v35 = vadd.f32 %v1425_v15, %v665_v61 }
 0x201   :  { %v2329_v11 = vpop.f32.mrf.mxu3 }
 0x202   :  { %v2395_v47 = vadd.f32 %v2329_v11, %v3956_v50 }
 0x203   :  { %v2281_v28 = vpop.f32.mrf.mxu2 }
 0x204   :  { %2587 = vst [vmem:[%s4092_s3 + $0x1f8] sm:$0xff] %v2395_v47  ;;  %v2379_v30 = vadd.f32 %v2281_v28, %v1523_v35 }
 0x206   :  { %2571 = vst [vmem:[%s4092_s3 + $0x178] sm:$0xff] %v2379_v30 }

</bundles_post_ra>
